<compile_context>
chip_gen: v7x
topology: tpu7x:2x2x1
jax: 0.10.0
libtpu: 0.0.40
codegen_flags: <defaults>
</compile_context>

<pallas_src>
import math

import jax
import jax.numpy as jnp
from jax.experimental import pallas as pl
from jax.experimental.pallas import tpu as pltpu

# ---------------- model config (small, BERT-shaped) ----------------
BATCH = 2
SEQ = 8
HIDDEN = 32
NUM_HEADS = 4
HEAD_DIM = HIDDEN // NUM_HEADS
INTERMEDIATE = 64
NUM_LAYERS = 2
VOCAB = 100
MAX_POS = 16
NUM_CLASSES = 2
LN_EPS = 1e-12
LANE = 128          # lane-dense padding for the classifier output


# ---------------- in-kernel helpers ----------------
def _layernorm(x, gamma, beta, eps=LN_EPS):
    mu = jnp.mean(x, axis=-1, keepdims=True)
    var = jnp.mean(jnp.square(x - mu), axis=-1, keepdims=True)
    return (x - mu) * jax.lax.rsqrt(var + eps) * gamma + beta


def _softmax_last(s):
    m = jnp.max(s, axis=-1, keepdims=True)
    e = jnp.exp(s - m)
    # divide -> EUP reciprocal (VALU slot stays free)
    return e * pl.reciprocal(jnp.sum(e, axis=-1, keepdims=True), approx=True)


def _gelu(x):
    # TODO(synk): BERT uses exact erf-based GELU; tanh approximation used here
    # (erf lowering in Mosaic is not guaranteed).
    c = math.sqrt(2.0 / math.pi)
    return 0.5 * x * (1.0 + jnp.tanh(c * (x + 0.044715 * x * x * x)))


# ---------------- fused forward kernel ----------------
def fused_forward_kernel(we_ref, pe_ref, te_ref, embg_ref, embb_ref, mask_ref,
                         wqkv_ref, bqkv_ref, wo_ref, bo_ref,
                         ln1g_ref, ln1b_ref, w1_ref, b1_ref, w2_ref, b2_ref,
                         ln2g_ref, ln2b_ref,
                         poolw_ref, poolb_ref, fcw_ref, fcb_ref,
                         out_ref, ctx_ref):
    B, S, H = we_ref.shape
    BS = B * S
    bf16 = jnp.bfloat16

    # ---- embeddings (token_type_ids assumed all-zero) + LayerNorm ----
    x = we_ref[...] + pe_ref[...] + te_ref[...]
    x2d = _layernorm(x, embg_ref[...], embb_ref[...]).reshape(BS, H)

    # additive attention-mask bias, broadcast ONCE (loop invariant)
    mask3 = mask_ref[...][:, None, :]                       # (B, 1, S)

    def layer_body(l, x2d):
        # fused QKV: one (BS,H) @ (H,3H) MXU matmul, bf16 operands, f32 acc
        qkv = jnp.dot(x2d.astype(bf16), wqkv_ref[l],
                      preferred_element_type=jnp.float32) + bqkv_ref[l]
        qkv3 = qkv.reshape(B, S, 3 * H)                     # free (leading split)

        # per-head attention; contexts land in VMEM scratch so the output
        # projection below is a single K=H matmul (not NUM_HEADS K=HEAD_DIM).
        for h in range(NUM_HEADS):
            lo = h * HEAD_DIM
            qh = qkv3[:, :, lo:lo + HEAD_DIM]               # scale already folded in
            kh = qkv3[:, :, H + lo:H + lo + HEAD_DIM]
            vh = qkv3[:, :, 2 * H + lo:2 * H + lo + HEAD_DIM]
            s = jnp.einsum('bqd,bkd->bqk', qh.astype(bf16), kh.astype(bf16),
                           preferred_element_type=jnp.float32)
            p = _softmax_last(s + mask3)
            ctx_ref[:, :, lo:lo + HEAD_DIM] = jnp.einsum(
                'bqk,bkd->bqd', p.astype(bf16), vh.astype(bf16),
                preferred_element_type=jnp.float32)

        attn = jnp.dot(ctx_ref[...].reshape(BS, H).astype(bf16), wo_ref[l],
                       preferred_element_type=jnp.float32) + bo_ref[l]
        h1 = _layernorm(attn + x2d, ln1g_ref[l], ln1b_ref[l])

        inter = _gelu(jnp.dot(h1.astype(bf16), w1_ref[l],
                              preferred_element_type=jnp.float32) + b1_ref[l])
        ffn = jnp.dot(inter.astype(bf16), w2_ref[l],
                      preferred_element_type=jnp.float32) + b2_ref[l]
        return _layernorm(ffn + h1, ln2g_ref[l], ln2b_ref[l])

    x2d = jax.lax.fori_loop(0, NUM_LAYERS, layer_body, x2d, unroll=True)

    # ---- BERT pooler (dense + tanh on CLS) + classifier fc (lane-padded) ----
    cls = x2d.reshape(B, S, H)[:, 0:1, :]                   # (B, 1, H)
    pooled = jnp.tanh(
        jnp.einsum('bsh,hk->bsk', cls.astype(bf16), poolw_ref[...],
                   preferred_element_type=jnp.float32) + poolb_ref[...])
    out_ref[...] = jnp.einsum('bsh,hk->bsk', pooled.astype(bf16), fcw_ref[...],
                              preferred_element_type=jnp.float32) + fcb_ref[...]


# ---------------- parameters (deterministic synthetic init) ----------------
def init_params(key):
    def nrm(k, shape):
        return (0.02 * jax.random.normal(k, shape)).astype(jnp.float32)

    keys = iter(jax.random.split(key, 8 + 8 * NUM_LAYERS))
    scale = 1.0 / math.sqrt(HEAD_DIM)
    bf16 = jnp.bfloat16

    params = {
        'word_emb': nrm(next(keys), (VOCAB, HIDDEN)),
        'pos_emb': nrm(next(keys), (MAX_POS, HIDDEN)),
        'type_emb': nrm(next(keys), (2, HIDDEN)),
        'emb_ln_g': jnp.ones((1, HIDDEN), jnp.float32),
        'emb_ln_b': jnp.zeros((1, HIDDEN), jnp.float32),
        'pool_w': nrm(next(keys), (HIDDEN, HIDDEN)).astype(bf16),
        'pool_b': jnp.zeros((1, HIDDEN), jnp.float32),
    }
    fc_w = nrm(next(keys), (HIDDEN, NUM_CLASSES))
    # lane-dense classifier: pad output features to a full 128-lane slab
    params['fc_w_pad'] = (jnp.zeros((HIDDEN, LANE), jnp.float32)
                          .at[:, :NUM_CLASSES].set(fc_w).astype(bf16))
    params['fc_b_pad'] = jnp.zeros((1, LANE), jnp.float32)

    wqkv, bqkv, wo, bo = [], [], [], []
    ln1_g, ln1_b, w1, b1, w2, b2, ln2_g, ln2_b = ([] for _ in range(8))
    for _ in range(NUM_LAYERS):
        # fold the 1/sqrt(head_dim) attention scale into the Q weights/bias
        wq = nrm(next(keys), (HIDDEN, HIDDEN)) * scale
        wk = nrm(next(keys), (HIDDEN, HIDDEN))
        wv = nrm(next(keys), (HIDDEN, HIDDEN))
        wqkv.append(jnp.concatenate([wq, wk, wv], axis=1))          # (H, 3H)
        bqkv.append(jnp.zeros((1, 3 * HIDDEN), jnp.float32))        # bq scaled too (zero)
        wo.append(nrm(next(keys), (HIDDEN, HIDDEN)))
        bo.append(jnp.zeros((1, HIDDEN), jnp.float32))
        ln1_g.append(jnp.ones((1, HIDDEN), jnp.float32))
        ln1_b.append(jnp.zeros((1, HIDDEN), jnp.float32))
        w1.append(nrm(next(keys), (HIDDEN, INTERMEDIATE)))
        b1.append(jnp.zeros((1, INTERMEDIATE), jnp.float32))
        w2.append(nrm(next(keys), (INTERMEDIATE, HIDDEN)))
        b2.append(jnp.zeros((1, HIDDEN), jnp.float32))
        ln2_g.append(jnp.ones((1, HIDDEN), jnp.float32))
        ln2_b.append(jnp.zeros((1, HIDDEN), jnp.float32))

    # stacked (L, ...) weights; matmul operands stored in bf16 (f32 accumulate)
    params['wqkv'] = jnp.stack(wqkv).astype(bf16)      # (L, H, 3H)
    params['bqkv'] = jnp.stack(bqkv)                   # (L, 1, 3H)
    params['wo'] = jnp.stack(wo).astype(bf16)          # (L, H, H)
    params['bo'] = jnp.stack(bo)                       # (L, 1, H)
    params['ln1_g'] = jnp.stack(ln1_g)
    params['ln1_b'] = jnp.stack(ln1_b)
    params['w1'] = jnp.stack(w1).astype(bf16)          # (L, H, I)
    params['b1'] = jnp.stack(b1)                       # (L, 1, I)
    params['w2'] = jnp.stack(w2).astype(bf16)          # (L, I, H)
    params['b2'] = jnp.stack(b2)                       # (L, 1, H)
    params['ln2_g'] = jnp.stack(ln2_g)
    params['ln2_b'] = jnp.stack(ln2_b)
    return params


# ---------------- forward (mirrors SimpleTransformer.forward) ----------------
def simple_transformer_forward(params, input_ids, attention_mask):
    B, S = input_ids.shape

    # Embedding gather is glue (data-dependent gather); everything else is in
    # the single fused kernel below.
    we = jnp.take(params['word_emb'], input_ids, axis=0)          # (B, S, H)
    pe = params['pos_emb'][:S]                                    # (S, H)
    te = params['type_emb'][0:1]                                  # (1, H) token type 0
    # HF-style extended attention mask: (1 - mask) * -10000, additive.
    mask_bias = (1.0 - attention_mask.astype(jnp.float32)) * -10000.0   # (B, S)

    args = (we, pe, te, params['emb_ln_g'], params['emb_ln_b'], mask_bias,
            params['wqkv'], params['bqkv'], params['wo'], params['bo'],
            params['ln1_g'], params['ln1_b'],
            params['w1'], params['b1'], params['w2'], params['b2'],
            params['ln2_g'], params['ln2_b'],
            params['pool_w'], params['pool_b'],
            params['fc_w_pad'], params['fc_b_pad'])

    out = pl.pallas_call(
        fused_forward_kernel,
        out_shape=jax.ShapeDtypeStruct((B, 1, LANE), jnp.float32),
        in_specs=[pl.BlockSpec(memory_space=pltpu.MemorySpace.VMEM)] * len(args),
        out_specs=pl.BlockSpec(memory_space=pltpu.MemorySpace.VMEM),
        scratch_shapes=[pltpu.VMEM((B, S, HIDDEN), jnp.float32)],   # per-head ctx
    )(*args)

    return out[:, 0, :NUM_CLASSES]                                # (B, 2) logits


if __name__ == "__main__":
    key = jax.random.PRNGKey(0)
    k_params, k_ids = jax.random.split(key)

    params = init_params(k_params)
    input_ids = jax.random.randint(k_ids, (BATCH, SEQ), 0, VOCAB, dtype=jnp.int32)
    attention_mask = jnp.ones((BATCH, SEQ), jnp.int32).at[1, SEQ - 2:].set(0)

    fwd = jax.jit(simple_transformer_forward)
    logits = fwd(params, input_ids, attention_mask)
    logits = jax.block_until_ready(logits)

    assert logits.shape == (BATCH, NUM_CLASSES) and logits.dtype == jnp.float32
    print("KERNEL_OK")
</pallas_src>

<mosaic_0001>
module attributes {stable_mosaic.version = 11 : i64} {
  func.func @fused_forward_kernel(%arg0: memref<2x8x32xf32, #tpu.memory_space<vmem>>, %arg1: memref<8x32xf32, #tpu.memory_space<vmem>>, %arg2: memref<1x32xf32, #tpu.memory_space<vmem>>, %arg3: memref<1x32xf32, #tpu.memory_space<vmem>>, %arg4: memref<1x32xf32, #tpu.memory_space<vmem>>, %arg5: memref<2x8xf32, #tpu.memory_space<vmem>>, %arg6: memref<2x32x96xbf16, #tpu.memory_space<vmem>>, %arg7: memref<2x1x96xf32, #tpu.memory_space<vmem>>, %arg8: memref<2x32x32xbf16, #tpu.memory_space<vmem>>, %arg9: memref<2x1x32xf32, #tpu.memory_space<vmem>>, %arg10: memref<2x1x32xf32, #tpu.memory_space<vmem>>, %arg11: memref<2x1x32xf32, #tpu.memory_space<vmem>>, %arg12: memref<2x32x64xbf16, #tpu.memory_space<vmem>>, %arg13: memref<2x1x64xf32, #tpu.memory_space<vmem>>, %arg14: memref<2x64x32xbf16, #tpu.memory_space<vmem>>, %arg15: memref<2x1x32xf32, #tpu.memory_space<vmem>>, %arg16: memref<2x1x32xf32, #tpu.memory_space<vmem>>, %arg17: memref<2x1x32xf32, #tpu.memory_space<vmem>>, %arg18: memref<32x32xbf16, #tpu.memory_space<vmem>>, %arg19: memref<1x32xf32, #tpu.memory_space<vmem>>, %arg20: memref<32x128xbf16, #tpu.memory_space<vmem>>, %arg21: memref<1x128xf32, #tpu.memory_space<vmem>>, %arg22: memref<2x1x128xf32, #tpu.memory_space<vmem>>, %arg23: memref<2x8x32xf32, #tpu.memory_space<vmem>>) attributes {dimension_semantics = [], scalar_prefetch = 0 : i64, scratch_operands = 1 : i64, tpu.core_type = #tpu.core_type<tc>} {
    %c0 = arith.constant 0 : index
    %c0_0 = arith.constant 0 : index
    %c0_1 = arith.constant 0 : index
    %0 = vector.load %arg0[%c0, %c0_0, %c0_1] : memref<2x8x32xf32, #tpu.memory_space<vmem>>, vector<2x8x32xf32>
    %c0_2 = arith.constant 0 : index
    %c0_3 = arith.constant 0 : index
    %1 = vector.load %arg1[%c0_2, %c0_3] : memref<8x32xf32, #tpu.memory_space<vmem>>, vector<8x32xf32>
    %2 = vector.shape_cast %1 : vector<8x32xf32> to vector<1x8x32xf32>
    %3 = vector.broadcast %2 : vector<1x8x32xf32> to vector<2x8x32xf32>
    %4 = arith.addf %0, %3 : vector<2x8x32xf32>
    %c0_4 = arith.constant 0 : index
    %c0_5 = arith.constant 0 : index
    %5 = vector.load %arg2[%c0_4, %c0_5] : memref<1x32xf32, #tpu.memory_space<vmem>>, vector<1x32xf32>
    %6 = vector.shape_cast %5 : vector<1x32xf32> to vector<1x1x32xf32>
    %7 = vector.broadcast %6 : vector<1x1x32xf32> to vector<2x8x32xf32>
    %8 = arith.addf %4, %7 : vector<2x8x32xf32>
    %c0_6 = arith.constant 0 : index
    %c0_7 = arith.constant 0 : index
    %9 = vector.load %arg3[%c0_6, %c0_7] : memref<1x32xf32, #tpu.memory_space<vmem>>, vector<1x32xf32>
    %c0_8 = arith.constant 0 : index
    %c0_9 = arith.constant 0 : index
    %10 = vector.load %arg4[%c0_8, %c0_9] : memref<1x32xf32, #tpu.memory_space<vmem>>, vector<1x32xf32>
    %cst = arith.constant dense<0.000000e+00> : vector<2x8xf32>
    %11 = vector.multi_reduction <add>, %8, %cst [2] : vector<2x8x32xf32> to vector<2x8xf32>
    %12 = vector.shape_cast %11 : vector<2x8xf32> to vector<2x8x1xf32>
    %cst_10 = arith.constant 3.200000e+01 : f32
    %13 = vector.broadcast %cst_10 : f32 to vector<2x8x1xf32>
    %14 = arith.divf %12, %13 : vector<2x8x1xf32>
    %15 = vector.broadcast %14 : vector<2x8x1xf32> to vector<2x8x32xf32>
    %16 = arith.subf %8, %15 : vector<2x8x32xf32>
    %17 = arith.mulf %16, %16 : vector<2x8x32xf32>
    %cst_11 = arith.constant dense<0.000000e+00> : vector<2x8xf32>
    %18 = vector.multi_reduction <add>, %17, %cst_11 [2] : vector<2x8x32xf32> to vector<2x8xf32>
    %19 = vector.shape_cast %18 : vector<2x8xf32> to vector<2x8x1xf32>
    %cst_12 = arith.constant 3.200000e+01 : f32
    %20 = vector.broadcast %cst_12 : f32 to vector<2x8x1xf32>
    %21 = arith.divf %19, %20 : vector<2x8x1xf32>
    %22 = vector.broadcast %14 : vector<2x8x1xf32> to vector<2x8x32xf32>
    %23 = arith.subf %8, %22 : vector<2x8x32xf32>
    %cst_13 = arith.constant 9.99999996E-13 : f32
    %24 = vector.broadcast %cst_13 : f32 to vector<2x8x1xf32>
    %25 = arith.addf %21, %24 : vector<2x8x1xf32>
    %26 = math.rsqrt %25 : vector<2x8x1xf32>
    %27 = vector.broadcast %26 : vector<2x8x1xf32> to vector<2x8x32xf32>
    %28 = arith.mulf %23, %27 : vector<2x8x32xf32>
    %29 = vector.shape_cast %9 : vector<1x32xf32> to vector<1x1x32xf32>
    %30 = vector.broadcast %29 : vector<1x1x32xf32> to vector<2x8x32xf32>
    %31 = arith.mulf %28, %30 : vector<2x8x32xf32>
    %32 = vector.shape_cast %10 : vector<1x32xf32> to vector<1x1x32xf32>
    %33 = vector.broadcast %32 : vector<1x1x32xf32> to vector<2x8x32xf32>
    %34 = arith.addf %31, %33 : vector<2x8x32xf32>
    %35 = vector.shape_cast %34 : vector<2x8x32xf32> to vector<16x32xf32>
    %c0_14 = arith.constant 0 : index
    %c0_15 = arith.constant 0 : index
    %36 = vector.load %arg5[%c0_14, %c0_15] : memref<2x8xf32, #tpu.memory_space<vmem>>, vector<2x8xf32>
    %37 = vector.shape_cast %36 : vector<2x8xf32> to vector<2x1x8xf32>
    %c0_i32 = arith.constant 0 : i32
    %38 = arith.truncf %35 : vector<16x32xf32> to vector<16x32xbf16>
    %39 = arith.index_cast %c0_i32 : i32 to index
    %c0_16 = arith.constant 0 : index
    %c0_17 = arith.constant 0 : index
    %40 = vector.load %arg6[%39, %c0_16, %c0_17] : memref<2x32x96xbf16, #tpu.memory_space<vmem>>, vector<1x32x96xbf16>
    %41 = vector.shape_cast %40 : vector<1x32x96xbf16> to vector<32x96xbf16>
    %cst_18 = arith.constant dense<0.000000e+00> : vector<16x96xf32>
    %42 = tpu.matmul %38, %41, %cst_18 {dimension_numbers = #tpu.dot_dimension_numbers<[1], [0], [0], [1], [0, 0, 1, 1], [], []>} : vector<16x32xbf16>, vector<32x96xbf16>, vector<16x96xf32> -> vector<16x96xf32>
    %43 = arith.index_cast %c0_i32 : i32 to index
    %c0_19 = arith.constant 0 : index
    %c0_20 = arith.constant 0 : index
    %44 = vector.load %arg7[%43, %c0_19, %c0_20] : memref<2x1x96xf32, #tpu.memory_space<vmem>>, vector<1x1x96xf32>
    %45 = vector.shape_cast %44 : vector<1x1x96xf32> to vector<1x96xf32>
    %46 = vector.broadcast %45 : vector<1x96xf32> to vector<16x96xf32>
    %47 = arith.addf %42, %46 : vector<16x96xf32>
    %48 = vector.shape_cast %47 : vector<16x96xf32> to vector<2x8x96xf32>
    %49 = vector.extract_strided_slice %48 {offsets = [0, 0, 0], sizes = [2, 8, 8], strides = [1, 1, 1]} : vector<2x8x96xf32> to vector<2x8x8xf32>
    %50 = vector.extract_strided_slice %48 {offsets = [0, 0, 32], sizes = [2, 8, 8], strides = [1, 1, 1]} : vector<2x8x96xf32> to vector<2x8x8xf32>
    %51 = vector.extract_strided_slice %48 {offsets = [0, 0, 64], sizes = [2, 8, 8], strides = [1, 1, 1]} : vector<2x8x96xf32> to vector<2x8x8xf32>
    %52 = arith.truncf %49 : vector<2x8x8xf32> to vector<2x8x8xbf16>
    %53 = arith.truncf %50 : vector<2x8x8xf32> to vector<2x8x8xbf16>
    "tpu.trace_start"() <{level = 10 : i32, message = "bqd,bkd->bqk"}> : () -> ()
    %cst_21 = arith.constant dense<0.000000e+00> : vector<2x8x8xf32>
    %54 = tpu.matmul %52, %53, %cst_21 {dimension_numbers = #tpu.dot_dimension_numbers<[2], [2], [1], [1], [0, 0, 0, 1, 1, 1], [0], [0]>} : vector<2x8x8xbf16>, vector<2x8x8xbf16>, vector<2x8x8xf32> -> vector<2x8x8xf32>
    "tpu.trace_stop"() : () -> ()
    %55 = vector.broadcast %37 : vector<2x1x8xf32> to vector<2x8x8xf32>
    %56 = arith.addf %54, %55 : vector<2x8x8xf32>
    %cst_22 = arith.constant dense<0xFF800000> : vector<2x8xf32>
    %57 = vector.multi_reduction <maximumf>, %56, %cst_22 [2] : vector<2x8x8xf32> to vector<2x8xf32>
    %58 = vector.shape_cast %57 : vector<2x8xf32> to vector<2x8x1xf32>
    %59 = vector.broadcast %58 : vector<2x8x1xf32> to vector<2x8x8xf32>
    %60 = arith.subf %56, %59 : vector<2x8x8xf32>
    %61 = math.exp %60 : vector<2x8x8xf32>
    %cst_23 = arith.constant dense<0.000000e+00> : vector<2x8xf32>
    %62 = vector.multi_reduction <add>, %61, %cst_23 [2] : vector<2x8x8xf32> to vector<2x8xf32>
    %63 = vector.shape_cast %62 : vector<2x8xf32> to vector<2x8x1xf32>
    %64 = tpu.reciprocal %63 {approx = true} : vector<2x8x1xf32> -> vector<2x8x1xf32>
    %65 = vector.broadcast %64 : vector<2x8x1xf32> to vector<2x8x8xf32>
    %66 = arith.mulf %61, %65 : vector<2x8x8xf32>
    %67 = arith.truncf %66 : vector<2x8x8xf32> to vector<2x8x8xbf16>
    %68 = arith.truncf %51 : vector<2x8x8xf32> to vector<2x8x8xbf16>
    "tpu.trace_start"() <{level = 10 : i32, message = "bqk,bkd->bqd"}> : () -> ()
    %cst_24 = arith.constant dense<0.000000e+00> : vector<2x8x8xf32>
    %69 = tpu.matmul %67, %68, %cst_24 {dimension_numbers = #tpu.dot_dimension_numbers<[2], [1], [1], [2], [0, 0, 0, 1, 1, 2], [0], [0]>} : vector<2x8x8xbf16>, vector<2x8x8xbf16>, vector<2x8x8xf32> -> vector<2x8x8xf32>
    "tpu.trace_stop"() : () -> ()
    %c0_25 = arith.constant 0 : index
    %c0_26 = arith.constant 0 : index
    %c0_27 = arith.constant 0 : index
    %70 = vector.load %arg23[%c0_25, %c0_26, %c0_27] : memref<2x8x32xf32, #tpu.memory_space<vmem>>, vector<2x8x8xf32>
    tpu.vector_store %arg23[%c0_25, %c0_26, %c0_27], %69 {strides = array<i32>} : memref<2x8x32xf32, #tpu.memory_space<vmem>>, vector<2x8x8xf32>,
    %71 = vector.extract_strided_slice %48 {offsets = [0, 0, 8], sizes = [2, 8, 8], strides = [1, 1, 1]} : vector<2x8x96xf32> to vector<2x8x8xf32>
    %72 = vector.extract_strided_slice %48 {offsets = [0, 0, 40], sizes = [2, 8, 8], strides = [1, 1, 1]} : vector<2x8x96xf32> to vector<2x8x8xf32>
    %73 = vector.extract_strided_slice %48 {offsets = [0, 0, 72], sizes = [2, 8, 8], strides = [1, 1, 1]} : vector<2x8x96xf32> to vector<2x8x8xf32>
    %74 = arith.truncf %71 : vector<2x8x8xf32> to vector<2x8x8xbf16>
    %75 = arith.truncf %72 : vector<2x8x8xf32> to vector<2x8x8xbf16>
    "tpu.trace_start"() <{level = 10 : i32, message = "bqd,bkd->bqk"}> : () -> ()
    %cst_28 = arith.constant dense<0.000000e+00> : vector<2x8x8xf32>
    %76 = tpu.matmul %74, %75, %cst_28 {dimension_numbers = #tpu.dot_dimension_numbers<[2], [2], [1], [1], [0, 0, 0, 1, 1, 1], [0], [0]>} : vector<2x8x8xbf16>, vector<2x8x8xbf16>, vector<2x8x8xf32> -> vector<2x8x8xf32>
    "tpu.trace_stop"() : () -> ()
    %77 = vector.broadcast %37 : vector<2x1x8xf32> to vector<2x8x8xf32>
    %78 = arith.addf %76, %77 : vector<2x8x8xf32>
    %cst_29 = arith.constant dense<0xFF800000> : vector<2x8xf32>
    %79 = vector.multi_reduction <maximumf>, %78, %cst_29 [2] : vector<2x8x8xf32> to vector<2x8xf32>
    %80 = vector.shape_cast %79 : vector<2x8xf32> to vector<2x8x1xf32>
    %81 = vector.broadcast %80 : vector<2x8x1xf32> to vector<2x8x8xf32>
    %82 = arith.subf %78, %81 : vector<2x8x8xf32>
    %83 = math.exp %82 : vector<2x8x8xf32>
    %cst_30 = arith.constant dense<0.000000e+00> : vector<2x8xf32>
    %84 = vector.multi_reduction <add>, %83, %cst_30 [2] : vector<2x8x8xf32> to vector<2x8xf32>
    %85 = vector.shape_cast %84 : vector<2x8xf32> to vector<2x8x1xf32>
    %86 = tpu.reciprocal %85 {approx = true} : vector<2x8x1xf32> -> vector<2x8x1xf32>
    %87 = vector.broadcast %86 : vector<2x8x1xf32> to vector<2x8x8xf32>
    %88 = arith.mulf %83, %87 : vector<2x8x8xf32>
    %89 = arith.truncf %88 : vector<2x8x8xf32> to vector<2x8x8xbf16>
    %90 = arith.truncf %73 : vector<2x8x8xf32> to vector<2x8x8xbf16>
    "tpu.trace_start"() <{level = 10 : i32, message = "bqk,bkd->bqd"}> : () -> ()
    %cst_31 = arith.constant dense<0.000000e+00> : vector<2x8x8xf32>
    %91 = tpu.matmul %89, %90, %cst_31 {dimension_numbers = #tpu.dot_dimension_numbers<[2], [1], [1], [2], [0, 0, 0, 1, 1, 2], [0], [0]>} : vector<2x8x8xbf16>, vector<2x8x8xbf16>, vector<2x8x8xf32> -> vector<2x8x8xf32>
    "tpu.trace_stop"() : () -> ()
    %c0_32 = arith.constant 0 : index
    %c0_33 = arith.constant 0 : index
    %c8 = arith.constant 8 : index
    %92 = vector.load %arg23[%c0_32, %c0_33, %c8] : memref<2x8x32xf32, #tpu.memory_space<vmem>>, vector<2x8x8xf32>
    tpu.vector_store %arg23[%c0_32, %c0_33, %c8], %91 {strides = array<i32>} : memref<2x8x32xf32, #tpu.memory_space<vmem>>, vector<2x8x8xf32>,
    %93 = vector.extract_strided_slice %48 {offsets = [0, 0, 16], sizes = [2, 8, 8], strides = [1, 1, 1]} : vector<2x8x96xf32> to vector<2x8x8xf32>
    %94 = vector.extract_strided_slice %48 {offsets = [0, 0, 48], sizes = [2, 8, 8], strides = [1, 1, 1]} : vector<2x8x96xf32> to vector<2x8x8xf32>
    %95 = vector.extract_strided_slice %48 {offsets = [0, 0, 80], sizes = [2, 8, 8], strides = [1, 1, 1]} : vector<2x8x96xf32> to vector<2x8x8xf32>
    %96 = arith.truncf %93 : vector<2x8x8xf32> to vector<2x8x8xbf16>
    %97 = arith.truncf %94 : vector<2x8x8xf32> to vector<2x8x8xbf16>
    "tpu.trace_start"() <{level = 10 : i32, message = "bqd,bkd->bqk"}> : () -> ()
    %cst_34 = arith.constant dense<0.000000e+00> : vector<2x8x8xf32>
    %98 = tpu.matmul %96, %97, %cst_34 {dimension_numbers = #tpu.dot_dimension_numbers<[2], [2], [1], [1], [0, 0, 0, 1, 1, 1], [0], [0]>} : vector<2x8x8xbf16>, vector<2x8x8xbf16>, vector<2x8x8xf32> -> vector<2x8x8xf32>
    "tpu.trace_stop"() : () -> ()
    %99 = vector.broadcast %37 : vector<2x1x8xf32> to vector<2x8x8xf32>
    %100 = arith.addf %98, %99 : vector<2x8x8xf32>
    %cst_35 = arith.constant dense<0xFF800000> : vector<2x8xf32>
    %101 = vector.multi_reduction <maximumf>, %100, %cst_35 [2] : vector<2x8x8xf32> to vector<2x8xf32>
    %102 = vector.shape_cast %101 : vector<2x8xf32> to vector<2x8x1xf32>
    %103 = vector.broadcast %102 : vector<2x8x1xf32> to vector<2x8x8xf32>
    %104 = arith.subf %100, %103 : vector<2x8x8xf32>
    %105 = math.exp %104 : vector<2x8x8xf32>
    %cst_36 = arith.constant dense<0.000000e+00> : vector<2x8xf32>
    %106 = vector.multi_reduction <add>, %105, %cst_36 [2] : vector<2x8x8xf32> to vector<2x8xf32>
    %107 = vector.shape_cast %106 : vector<2x8xf32> to vector<2x8x1xf32>
    %108 = tpu.reciprocal %107 {approx = true} : vector<2x8x1xf32> -> vector<2x8x1xf32>
    %109 = vector.broadcast %108 : vector<2x8x1xf32> to vector<2x8x8xf32>
    %110 = arith.mulf %105, %109 : vector<2x8x8xf32>
    %111 = arith.truncf %110 : vector<2x8x8xf32> to vector<2x8x8xbf16>
    %112 = arith.truncf %95 : vector<2x8x8xf32> to vector<2x8x8xbf16>
    "tpu.trace_start"() <{level = 10 : i32, message = "bqk,bkd->bqd"}> : () -> ()
    %cst_37 = arith.constant dense<0.000000e+00> : vector<2x8x8xf32>
    %113 = tpu.matmul %111, %112, %cst_37 {dimension_numbers = #tpu.dot_dimension_numbers<[2], [1], [1], [2], [0, 0, 0, 1, 1, 2], [0], [0]>} : vector<2x8x8xbf16>, vector<2x8x8xbf16>, vector<2x8x8xf32> -> vector<2x8x8xf32>
    "tpu.trace_stop"() : () -> ()
    %c0_38 = arith.constant 0 : index
    %c0_39 = arith.constant 0 : index
    %c16 = arith.constant 16 : index
    %114 = vector.load %arg23[%c0_38, %c0_39, %c16] : memref<2x8x32xf32, #tpu.memory_space<vmem>>, vector<2x8x8xf32>
    tpu.vector_store %arg23[%c0_38, %c0_39, %c16], %113 {strides = array<i32>} : memref<2x8x32xf32, #tpu.memory_space<vmem>>, vector<2x8x8xf32>,
    %115 = vector.extract_strided_slice %48 {offsets = [0, 0, 24], sizes = [2, 8, 8], strides = [1, 1, 1]} : vector<2x8x96xf32> to vector<2x8x8xf32>
    %116 = vector.extract_strided_slice %48 {offsets = [0, 0, 56], sizes = [2, 8, 8], strides = [1, 1, 1]} : vector<2x8x96xf32> to vector<2x8x8xf32>
    %117 = vector.extract_strided_slice %48 {offsets = [0, 0, 88], sizes = [2, 8, 8], strides = [1, 1, 1]} : vector<2x8x96xf32> to vector<2x8x8xf32>
    %118 = arith.truncf %115 : vector<2x8x8xf32> to vector<2x8x8xbf16>
    %119 = arith.truncf %116 : vector<2x8x8xf32> to vector<2x8x8xbf16>
    "tpu.trace_start"() <{level = 10 : i32, message = "bqd,bkd->bqk"}> : () -> ()
    %cst_40 = arith.constant dense<0.000000e+00> : vector<2x8x8xf32>
    %120 = tpu.matmul %118, %119, %cst_40 {dimension_numbers = #tpu.dot_dimension_numbers<[2], [2], [1], [1], [0, 0, 0, 1, 1, 1], [0], [0]>} : vector<2x8x8xbf16>, vector<2x8x8xbf16>, vector<2x8x8xf32> -> vector<2x8x8xf32>
    "tpu.trace_stop"() : () -> ()
    %121 = vector.broadcast %37 : vector<2x1x8xf32> to vector<2x8x8xf32>
    %122 = arith.addf %120, %121 : vector<2x8x8xf32>
    %cst_41 = arith.constant dense<0xFF800000> : vector<2x8xf32>
    %123 = vector.multi_reduction <maximumf>, %122, %cst_41 [2] : vector<2x8x8xf32> to vector<2x8xf32>
    %124 = vector.shape_cast %123 : vector<2x8xf32> to vector<2x8x1xf32>
    %125 = vector.broadcast %124 : vector<2x8x1xf32> to vector<2x8x8xf32>
    %126 = arith.subf %122, %125 : vector<2x8x8xf32>
    %127 = math.exp %126 : vector<2x8x8xf32>
    %cst_42 = arith.constant dense<0.000000e+00> : vector<2x8xf32>
    %128 = vector.multi_reduction <add>, %127, %cst_42 [2] : vector<2x8x8xf32> to vector<2x8xf32>
    %129 = vector.shape_cast %128 : vector<2x8xf32> to vector<2x8x1xf32>
    %130 = tpu.reciprocal %129 {approx = true} : vector<2x8x1xf32> -> vector<2x8x1xf32>
    %131 = vector.broadcast %130 : vector<2x8x1xf32> to vector<2x8x8xf32>
    %132 = arith.mulf %127, %131 : vector<2x8x8xf32>
    %133 = arith.truncf %132 : vector<2x8x8xf32> to vector<2x8x8xbf16>
    %134 = arith.truncf %117 : vector<2x8x8xf32> to vector<2x8x8xbf16>
    "tpu.trace_start"() <{level = 10 : i32, message = "bqk,bkd->bqd"}> : () -> ()
    %cst_43 = arith.constant dense<0.000000e+00> : vector<2x8x8xf32>
    %135 = tpu.matmul %133, %134, %cst_43 {dimension_numbers = #tpu.dot_dimension_numbers<[2], [1], [1], [2], [0, 0, 0, 1, 1, 2], [0], [0]>} : vector<2x8x8xbf16>, vector<2x8x8xbf16>, vector<2x8x8xf32> -> vector<2x8x8xf32>
    "tpu.trace_stop"() : () -> ()
    %c0_44 = arith.constant 0 : index
    %c0_45 = arith.constant 0 : index
    %c24 = arith.constant 24 : index
    %136 = vector.load %arg23[%c0_44, %c0_45, %c24] : memref<2x8x32xf32, #tpu.memory_space<vmem>>, vector<2x8x8xf32>
    tpu.vector_store %arg23[%c0_44, %c0_45, %c24], %135 {strides = array<i32>} : memref<2x8x32xf32, #tpu.memory_space<vmem>>, vector<2x8x8xf32>,
    %c0_46 = arith.constant 0 : index
    %c0_47 = arith.constant 0 : index
    %c0_48 = arith.constant 0 : index
    %137 = vector.load %arg23[%c0_46, %c0_47, %c0_48] : memref<2x8x32xf32, #tpu.memory_space<vmem>>, vector<2x8x32xf32>
    %138 = vector.shape_cast %137 : vector<2x8x32xf32> to vector<16x32xf32>
    %139 = arith.truncf %138 : vector<16x32xf32> to vector<16x32xbf16>
    %140 = arith.index_cast %c0_i32 : i32 to index
    %c0_49 = arith.constant 0 : index
    %c0_50 = arith.constant 0 : index
    %141 = vector.load %arg8[%140, %c0_49, %c0_50] : memref<2x32x32xbf16, #tpu.memory_space<vmem>>, vector<1x32x32xbf16>
    %142 = vector.shape_cast %141 : vector<1x32x32xbf16> to vector<32x32xbf16>
    %cst_51 = arith.constant dense<0.000000e+00> : vector<16x32xf32>
    %143 = tpu.matmul %139, %142, %cst_51 {dimension_numbers = #tpu.dot_dimension_numbers<[1], [0], [0], [1], [0, 0, 1, 1], [], []>} : vector<16x32xbf16>, vector<32x32xbf16>, vector<16x32xf32> -> vector<16x32xf32>
    %144 = arith.index_cast %c0_i32 : i32 to index
    %c0_52 = arith.constant 0 : index
    %c0_53 = arith.constant 0 : index
    %145 = vector.load %arg9[%144, %c0_52, %c0_53] : memref<2x1x32xf32, #tpu.memory_space<vmem>>, vector<1x1x32xf32>
    %146 = vector.shape_cast %145 : vector<1x1x32xf32> to vector<1x32xf32>
    %147 = vector.broadcast %146 : vector<1x32xf32> to vector<16x32xf32>
    %148 = arith.addf %143, %147 : vector<16x32xf32>
    %149 = arith.addf %148, %35 : vector<16x32xf32>
    %150 = arith.index_cast %c0_i32 : i32 to index
    %c0_54 = arith.constant 0 : index
    %c0_55 = arith.constant 0 : index
    %151 = vector.load %arg10[%150, %c0_54, %c0_55] : memref<2x1x32xf32, #tpu.memory_space<vmem>>, vector<1x1x32xf32>
    %152 = vector.shape_cast %151 : vector<1x1x32xf32> to vector<1x32xf32>
    %153 = arith.index_cast %c0_i32 : i32 to index
    %c0_56 = arith.constant 0 : index
    %c0_57 = arith.constant 0 : index
    %154 = vector.load %arg11[%153, %c0_56, %c0_57] : memref<2x1x32xf32, #tpu.memory_space<vmem>>, vector<1x1x32xf32>
    %155 = vector.shape_cast %154 : vector<1x1x32xf32> to vector<1x32xf32>
    %cst_58 = arith.constant dense<0.000000e+00> : vector<16xf32>
    %156 = vector.multi_reduction <add>, %149, %cst_58 [1] : vector<16x32xf32> to vector<16xf32>
    %157 = vector.shape_cast %156 : vector<16xf32> to vector<16x1xf32>
    %cst_59 = arith.constant 3.200000e+01 : f32
    %158 = vector.broadcast %cst_59 : f32 to vector<16x1xf32>
    %159 = arith.divf %157, %158 : vector<16x1xf32>
    %160 = vector.broadcast %159 : vector<16x1xf32> to vector<16x32xf32>
    %161 = arith.subf %149, %160 : vector<16x32xf32>
    %162 = arith.mulf %161, %161 : vector<16x32xf32>
    %cst_60 = arith.constant dense<0.000000e+00> : vector<16xf32>
    %163 = vector.multi_reduction <add>, %162, %cst_60 [1] : vector<16x32xf32> to vector<16xf32>
    %164 = vector.shape_cast %163 : vector<16xf32> to vector<16x1xf32>
    %cst_61 = arith.constant 3.200000e+01 : f32
    %165 = vector.broadcast %cst_61 : f32 to vector<16x1xf32>
    %166 = arith.divf %164, %165 : vector<16x1xf32>
    %167 = vector.broadcast %159 : vector<16x1xf32> to vector<16x32xf32>
    %168 = arith.subf %149, %167 : vector<16x32xf32>
    %cst_62 = arith.constant 9.99999996E-13 : f32
    %169 = vector.broadcast %cst_62 : f32 to vector<16x1xf32>
    %170 = arith.addf %166, %169 : vector<16x1xf32>
    %171 = math.rsqrt %170 : vector<16x1xf32>
    %172 = vector.broadcast %171 : vector<16x1xf32> to vector<16x32xf32>
    %173 = arith.mulf %168, %172 : vector<16x32xf32>
    %174 = vector.broadcast %152 : vector<1x32xf32> to vector<16x32xf32>
    %175 = arith.mulf %173, %174 : vector<16x32xf32>
    %176 = vector.broadcast %155 : vector<1x32xf32> to vector<16x32xf32>
    %177 = arith.addf %175, %176 : vector<16x32xf32>
    %178 = arith.truncf %177 : vector<16x32xf32> to vector<16x32xbf16>
    %179 = arith.index_cast %c0_i32 : i32 to index
    %c0_63 = arith.constant 0 : index
    %c0_64 = arith.constant 0 : index
    %180 = vector.load %arg12[%179, %c0_63, %c0_64] : memref<2x32x64xbf16, #tpu.memory_space<vmem>>, vector<1x32x64xbf16>
    %181 = vector.shape_cast %180 : vector<1x32x64xbf16> to vector<32x64xbf16>
    %cst_65 = arith.constant dense<0.000000e+00> : vector<16x64xf32>
    %182 = tpu.matmul %178, %181, %cst_65 {dimension_numbers = #tpu.dot_dimension_numbers<[1], [0], [0], [1], [0, 0, 1, 1], [], []>} : vector<16x32xbf16>, vector<32x64xbf16>, vector<16x64xf32> -> vector<16x64xf32>
    %183 = arith.index_cast %c0_i32 : i32 to index
    %c0_66 = arith.constant 0 : index
    %c0_67 = arith.constant 0 : index
    %184 = vector.load %arg13[%183, %c0_66, %c0_67] : memref<2x1x64xf32, #tpu.memory_space<vmem>>, vector<1x1x64xf32>
    %185 = vector.shape_cast %184 : vector<1x1x64xf32> to vector<1x64xf32>
    %186 = vector.broadcast %185 : vector<1x64xf32> to vector<16x64xf32>
    %187 = arith.addf %182, %186 : vector<16x64xf32>
    %cst_68 = arith.constant 5.000000e-01 : f32
    %188 = vector.broadcast %cst_68 : f32 to vector<16x64xf32>
    %189 = arith.mulf %188, %187 : vector<16x64xf32>
    %cst_69 = arith.constant 4.471500e-02 : f32
    %190 = vector.broadcast %cst_69 : f32 to vector<16x64xf32>
    %191 = arith.mulf %190, %187 : vector<16x64xf32>
    %192 = arith.mulf %191, %187 : vector<16x64xf32>
    %193 = arith.mulf %192, %187 : vector<16x64xf32>
    %194 = arith.addf %187, %193 : vector<16x64xf32>
    %cst_70 = arith.constant 0.797884583 : f32
    %195 = vector.broadcast %cst_70 : f32 to vector<16x64xf32>
    %196 = arith.mulf %195, %194 : vector<16x64xf32>
    %197 = math.tanh %196 : vector<16x64xf32>
    %cst_71 = arith.constant 1.000000e+00 : f32
    %198 = vector.broadcast %cst_71 : f32 to vector<16x64xf32>
    %199 = arith.addf %198, %197 : vector<16x64xf32>
    %200 = arith.mulf %189, %199 : vector<16x64xf32>
    %201 = arith.truncf %200 : vector<16x64xf32> to vector<16x64xbf16>
    %202 = arith.index_cast %c0_i32 : i32 to index
    %c0_72 = arith.constant 0 : index
    %c0_73 = arith.constant 0 : index
    %203 = vector.load %arg14[%202, %c0_72, %c0_73] : memref<2x64x32xbf16, #tpu.memory_space<vmem>>, vector<1x64x32xbf16>
    %204 = vector.shape_cast %203 : vector<1x64x32xbf16> to vector<64x32xbf16>
    %cst_74 = arith.constant dense<0.000000e+00> : vector<16x32xf32>
    %205 = tpu.matmul %201, %204, %cst_74 {dimension_numbers = #tpu.dot_dimension_numbers<[1], [0], [0], [1], [0, 0, 1, 1], [], []>} : vector<16x64xbf16>, vector<64x32xbf16>, vector<16x32xf32> -> vector<16x32xf32>
    %206 = arith.index_cast %c0_i32 : i32 to index
    %c0_75 = arith.constant 0 : index
    %c0_76 = arith.constant 0 : index
    %207 = vector.load %arg15[%206, %c0_75, %c0_76] : memref<2x1x32xf32, #tpu.memory_space<vmem>>, vector<1x1x32xf32>
    %208 = vector.shape_cast %207 : vector<1x1x32xf32> to vector<1x32xf32>
    %209 = vector.broadcast %208 : vector<1x32xf32> to vector<16x32xf32>
    %210 = arith.addf %205, %209 : vector<16x32xf32>
    %211 = arith.addf %210, %177 : vector<16x32xf32>
    %212 = arith.index_cast %c0_i32 : i32 to index
    %c0_77 = arith.constant 0 : index
    %c0_78 = arith.constant 0 : index
    %213 = vector.load %arg16[%212, %c0_77, %c0_78] : memref<2x1x32xf32, #tpu.memory_space<vmem>>, vector<1x1x32xf32>
    %214 = vector.shape_cast %213 : vector<1x1x32xf32> to vector<1x32xf32>
    %215 = arith.index_cast %c0_i32 : i32 to index
    %c0_79 = arith.constant 0 : index
    %c0_80 = arith.constant 0 : index
    %216 = vector.load %arg17[%215, %c0_79, %c0_80] : memref<2x1x32xf32, #tpu.memory_space<vmem>>, vector<1x1x32xf32>
    %217 = vector.shape_cast %216 : vector<1x1x32xf32> to vector<1x32xf32>
    %cst_81 = arith.constant dense<0.000000e+00> : vector<16xf32>
    %218 = vector.multi_reduction <add>, %211, %cst_81 [1] : vector<16x32xf32> to vector<16xf32>
    %219 = vector.shape_cast %218 : vector<16xf32> to vector<16x1xf32>
    %cst_82 = arith.constant 3.200000e+01 : f32
    %220 = vector.broadcast %cst_82 : f32 to vector<16x1xf32>
    %221 = arith.divf %219, %220 : vector<16x1xf32>
    %222 = vector.broadcast %221 : vector<16x1xf32> to vector<16x32xf32>
    %223 = arith.subf %211, %222 : vector<16x32xf32>
    %224 = arith.mulf %223, %223 : vector<16x32xf32>
    %cst_83 = arith.constant dense<0.000000e+00> : vector<16xf32>
    %225 = vector.multi_reduction <add>, %224, %cst_83 [1] : vector<16x32xf32> to vector<16xf32>
    %226 = vector.shape_cast %225 : vector<16xf32> to vector<16x1xf32>
    %cst_84 = arith.constant 3.200000e+01 : f32
    %227 = vector.broadcast %cst_84 : f32 to vector<16x1xf32>
    %228 = arith.divf %226, %227 : vector<16x1xf32>
    %229 = vector.broadcast %221 : vector<16x1xf32> to vector<16x32xf32>
    %230 = arith.subf %211, %229 : vector<16x32xf32>
    %cst_85 = arith.constant 9.99999996E-13 : f32
    %231 = vector.broadcast %cst_85 : f32 to vector<16x1xf32>
    %232 = arith.addf %228, %231 : vector<16x1xf32>
    %233 = math.rsqrt %232 : vector<16x1xf32>
    %234 = vector.broadcast %233 : vector<16x1xf32> to vector<16x32xf32>
    %235 = arith.mulf %230, %234 : vector<16x32xf32>
    %236 = vector.broadcast %214 : vector<1x32xf32> to vector<16x32xf32>
    %237 = arith.mulf %235, %236 : vector<16x32xf32>
    %238 = vector.broadcast %217 : vector<1x32xf32> to vector<16x32xf32>
    %239 = arith.addf %237, %238 : vector<16x32xf32>
    %c1_i32 = arith.constant 1 : i32
    %240 = arith.truncf %239 : vector<16x32xf32> to vector<16x32xbf16>
    %241 = arith.index_cast %c1_i32 : i32 to index
    %c0_86 = arith.constant 0 : index
    %c0_87 = arith.constant 0 : index
    %242 = vector.load %arg6[%241, %c0_86, %c0_87] : memref<2x32x96xbf16, #tpu.memory_space<vmem>>, vector<1x32x96xbf16>
    %243 = vector.shape_cast %242 : vector<1x32x96xbf16> to vector<32x96xbf16>
    %cst_88 = arith.constant dense<0.000000e+00> : vector<16x96xf32>
    %244 = tpu.matmul %240, %243, %cst_88 {dimension_numbers = #tpu.dot_dimension_numbers<[1], [0], [0], [1], [0, 0, 1, 1], [], []>} : vector<16x32xbf16>, vector<32x96xbf16>, vector<16x96xf32> -> vector<16x96xf32>
    %245 = arith.index_cast %c1_i32 : i32 to index
    %c0_89 = arith.constant 0 : index
    %c0_90 = arith.constant 0 : index
    %246 = vector.load %arg7[%245, %c0_89, %c0_90] : memref<2x1x96xf32, #tpu.memory_space<vmem>>, vector<1x1x96xf32>
    %247 = vector.shape_cast %246 : vector<1x1x96xf32> to vector<1x96xf32>
    %248 = vector.broadcast %247 : vector<1x96xf32> to vector<16x96xf32>
    %249 = arith.addf %244, %248 : vector<16x96xf32>
    %250 = vector.shape_cast %249 : vector<16x96xf32> to vector<2x8x96xf32>
    %251 = vector.extract_strided_slice %250 {offsets = [0, 0, 0], sizes = [2, 8, 8], strides = [1, 1, 1]} : vector<2x8x96xf32> to vector<2x8x8xf32>
    %252 = vector.extract_strided_slice %250 {offsets = [0, 0, 32], sizes = [2, 8, 8], strides = [1, 1, 1]} : vector<2x8x96xf32> to vector<2x8x8xf32>
    %253 = vector.extract_strided_slice %250 {offsets = [0, 0, 64], sizes = [2, 8, 8], strides = [1, 1, 1]} : vector<2x8x96xf32> to vector<2x8x8xf32>
    %254 = arith.truncf %251 : vector<2x8x8xf32> to vector<2x8x8xbf16>
    %255 = arith.truncf %252 : vector<2x8x8xf32> to vector<2x8x8xbf16>
    "tpu.trace_start"() <{level = 10 : i32, message = "bqd,bkd->bqk"}> : () -> ()
    %cst_91 = arith.constant dense<0.000000e+00> : vector<2x8x8xf32>
    %256 = tpu.matmul %254, %255, %cst_91 {dimension_numbers = #tpu.dot_dimension_numbers<[2], [2], [1], [1], [0, 0, 0, 1, 1, 1], [0], [0]>} : vector<2x8x8xbf16>, vector<2x8x8xbf16>, vector<2x8x8xf32> -> vector<2x8x8xf32>
    "tpu.trace_stop"() : () -> ()
    %257 = vector.broadcast %37 : vector<2x1x8xf32> to vector<2x8x8xf32>
    %258 = arith.addf %256, %257 : vector<2x8x8xf32>
    %cst_92 = arith.constant dense<0xFF800000> : vector<2x8xf32>
    %259 = vector.multi_reduction <maximumf>, %258, %cst_92 [2] : vector<2x8x8xf32> to vector<2x8xf32>
    %260 = vector.shape_cast %259 : vector<2x8xf32> to vector<2x8x1xf32>
    %261 = vector.broadcast %260 : vector<2x8x1xf32> to vector<2x8x8xf32>
    %262 = arith.subf %258, %261 : vector<2x8x8xf32>
    %263 = math.exp %262 : vector<2x8x8xf32>
    %cst_93 = arith.constant dense<0.000000e+00> : vector<2x8xf32>
    %264 = vector.multi_reduction <add>, %263, %cst_93 [2] : vector<2x8x8xf32> to vector<2x8xf32>
    %265 = vector.shape_cast %264 : vector<2x8xf32> to vector<2x8x1xf32>
    %266 = tpu.reciprocal %265 {approx = true} : vector<2x8x1xf32> -> vector<2x8x1xf32>
    %267 = vector.broadcast %266 : vector<2x8x1xf32> to vector<2x8x8xf32>
    %268 = arith.mulf %263, %267 : vector<2x8x8xf32>
    %269 = arith.truncf %268 : vector<2x8x8xf32> to vector<2x8x8xbf16>
    %270 = arith.truncf %253 : vector<2x8x8xf32> to vector<2x8x8xbf16>
    "tpu.trace_start"() <{level = 10 : i32, message = "bqk,bkd->bqd"}> : () -> ()
    %cst_94 = arith.constant dense<0.000000e+00> : vector<2x8x8xf32>
    %271 = tpu.matmul %269, %270, %cst_94 {dimension_numbers = #tpu.dot_dimension_numbers<[2], [1], [1], [2], [0, 0, 0, 1, 1, 2], [0], [0]>} : vector<2x8x8xbf16>, vector<2x8x8xbf16>, vector<2x8x8xf32> -> vector<2x8x8xf32>
    "tpu.trace_stop"() : () -> ()
    %c0_95 = arith.constant 0 : index
    %c0_96 = arith.constant 0 : index
    %c0_97 = arith.constant 0 : index
    %272 = vector.load %arg23[%c0_95, %c0_96, %c0_97] : memref<2x8x32xf32, #tpu.memory_space<vmem>>, vector<2x8x8xf32>
    tpu.vector_store %arg23[%c0_95, %c0_96, %c0_97], %271 {strides = array<i32>} : memref<2x8x32xf32, #tpu.memory_space<vmem>>, vector<2x8x8xf32>,
    %273 = vector.extract_strided_slice %250 {offsets = [0, 0, 8], sizes = [2, 8, 8], strides = [1, 1, 1]} : vector<2x8x96xf32> to vector<2x8x8xf32>
    %274 = vector.extract_strided_slice %250 {offsets = [0, 0, 40], sizes = [2, 8, 8], strides = [1, 1, 1]} : vector<2x8x96xf32> to vector<2x8x8xf32>
    %275 = vector.extract_strided_slice %250 {offsets = [0, 0, 72], sizes = [2, 8, 8], strides = [1, 1, 1]} : vector<2x8x96xf32> to vector<2x8x8xf32>
    %276 = arith.truncf %273 : vector<2x8x8xf32> to vector<2x8x8xbf16>
    %277 = arith.truncf %274 : vector<2x8x8xf32> to vector<2x8x8xbf16>
    "tpu.trace_start"() <{level = 10 : i32, message = "bqd,bkd->bqk"}> : () -> ()
    %cst_98 = arith.constant dense<0.000000e+00> : vector<2x8x8xf32>
    %278 = tpu.matmul %276, %277, %cst_98 {dimension_numbers = #tpu.dot_dimension_numbers<[2], [2], [1], [1], [0, 0, 0, 1, 1, 1], [0], [0]>} : vector<2x8x8xbf16>, vector<2x8x8xbf16>, vector<2x8x8xf32> -> vector<2x8x8xf32>
    "tpu.trace_stop"() : () -> ()
    %279 = vector.broadcast %37 : vector<2x1x8xf32> to vector<2x8x8xf32>
    %280 = arith.addf %278, %279 : vector<2x8x8xf32>
    %cst_99 = arith.constant dense<0xFF800000> : vector<2x8xf32>
    %281 = vector.multi_reduction <maximumf>, %280, %cst_99 [2] : vector<2x8x8xf32> to vector<2x8xf32>
    %282 = vector.shape_cast %281 : vector<2x8xf32> to vector<2x8x1xf32>
    %283 = vector.broadcast %282 : vector<2x8x1xf32> to vector<2x8x8xf32>
    %284 = arith.subf %280, %283 : vector<2x8x8xf32>
    %285 = math.exp %284 : vector<2x8x8xf32>
    %cst_100 = arith.constant dense<0.000000e+00> : vector<2x8xf32>
    %286 = vector.multi_reduction <add>, %285, %cst_100 [2] : vector<2x8x8xf32> to vector<2x8xf32>
    %287 = vector.shape_cast %286 : vector<2x8xf32> to vector<2x8x1xf32>
    %288 = tpu.reciprocal %287 {approx = true} : vector<2x8x1xf32> -> vector<2x8x1xf32>
    %289 = vector.broadcast %288 : vector<2x8x1xf32> to vector<2x8x8xf32>
    %290 = arith.mulf %285, %289 : vector<2x8x8xf32>
    %291 = arith.truncf %290 : vector<2x8x8xf32> to vector<2x8x8xbf16>
    %292 = arith.truncf %275 : vector<2x8x8xf32> to vector<2x8x8xbf16>
    "tpu.trace_start"() <{level = 10 : i32, message = "bqk,bkd->bqd"}> : () -> ()
    %cst_101 = arith.constant dense<0.000000e+00> : vector<2x8x8xf32>
    %293 = tpu.matmul %291, %292, %cst_101 {dimension_numbers = #tpu.dot_dimension_numbers<[2], [1], [1], [2], [0, 0, 0, 1, 1, 2], [0], [0]>} : vector<2x8x8xbf16>, vector<2x8x8xbf16>, vector<2x8x8xf32> -> vector<2x8x8xf32>
    "tpu.trace_stop"() : () -> ()
    %c0_102 = arith.constant 0 : index
    %c0_103 = arith.constant 0 : index
    %c8_104 = arith.constant 8 : index
    %294 = vector.load %arg23[%c0_102, %c0_103, %c8_104] : memref<2x8x32xf32, #tpu.memory_space<vmem>>, vector<2x8x8xf32>
    tpu.vector_store %arg23[%c0_102, %c0_103, %c8_104], %293 {strides = array<i32>} : memref<2x8x32xf32, #tpu.memory_space<vmem>>, vector<2x8x8xf32>,
    %295 = vector.extract_strided_slice %250 {offsets = [0, 0, 16], sizes = [2, 8, 8], strides = [1, 1, 1]} : vector<2x8x96xf32> to vector<2x8x8xf32>
    %296 = vector.extract_strided_slice %250 {offsets = [0, 0, 48], sizes = [2, 8, 8], strides = [1, 1, 1]} : vector<2x8x96xf32> to vector<2x8x8xf32>
    %297 = vector.extract_strided_slice %250 {offsets = [0, 0, 80], sizes = [2, 8, 8], strides = [1, 1, 1]} : vector<2x8x96xf32> to vector<2x8x8xf32>
    %298 = arith.truncf %295 : vector<2x8x8xf32> to vector<2x8x8xbf16>
    %299 = arith.truncf %296 : vector<2x8x8xf32> to vector<2x8x8xbf16>
    "tpu.trace_start"() <{level = 10 : i32, message = "bqd,bkd->bqk"}> : () -> ()
    %cst_105 = arith.constant dense<0.000000e+00> : vector<2x8x8xf32>
    %300 = tpu.matmul %298, %299, %cst_105 {dimension_numbers = #tpu.dot_dimension_numbers<[2], [2], [1], [1], [0, 0, 0, 1, 1, 1], [0], [0]>} : vector<2x8x8xbf16>, vector<2x8x8xbf16>, vector<2x8x8xf32> -> vector<2x8x8xf32>
    "tpu.trace_stop"() : () -> ()
    %301 = vector.broadcast %37 : vector<2x1x8xf32> to vector<2x8x8xf32>
    %302 = arith.addf %300, %301 : vector<2x8x8xf32>
    %cst_106 = arith.constant dense<0xFF800000> : vector<2x8xf32>
    %303 = vector.multi_reduction <maximumf>, %302, %cst_106 [2] : vector<2x8x8xf32> to vector<2x8xf32>
    %304 = vector.shape_cast %303 : vector<2x8xf32> to vector<2x8x1xf32>
    %305 = vector.broadcast %304 : vector<2x8x1xf32> to vector<2x8x8xf32>
    %306 = arith.subf %302, %305 : vector<2x8x8xf32>
    %307 = math.exp %306 : vector<2x8x8xf32>
    %cst_107 = arith.constant dense<0.000000e+00> : vector<2x8xf32>
    %308 = vector.multi_reduction <add>, %307, %cst_107 [2] : vector<2x8x8xf32> to vector<2x8xf32>
    %309 = vector.shape_cast %308 : vector<2x8xf32> to vector<2x8x1xf32>
    %310 = tpu.reciprocal %309 {approx = true} : vector<2x8x1xf32> -> vector<2x8x1xf32>
    %311 = vector.broadcast %310 : vector<2x8x1xf32> to vector<2x8x8xf32>
    %312 = arith.mulf %307, %311 : vector<2x8x8xf32>
    %313 = arith.truncf %312 : vector<2x8x8xf32> to vector<2x8x8xbf16>
    %314 = arith.truncf %297 : vector<2x8x8xf32> to vector<2x8x8xbf16>
    "tpu.trace_start"() <{level = 10 : i32, message = "bqk,bkd->bqd"}> : () -> ()
    %cst_108 = arith.constant dense<0.000000e+00> : vector<2x8x8xf32>
    %315 = tpu.matmul %313, %314, %cst_108 {dimension_numbers = #tpu.dot_dimension_numbers<[2], [1], [1], [2], [0, 0, 0, 1, 1, 2], [0], [0]>} : vector<2x8x8xbf16>, vector<2x8x8xbf16>, vector<2x8x8xf32> -> vector<2x8x8xf32>
    "tpu.trace_stop"() : () -> ()
    %c0_109 = arith.constant 0 : index
    %c0_110 = arith.constant 0 : index
    %c16_111 = arith.constant 16 : index
    %316 = vector.load %arg23[%c0_109, %c0_110, %c16_111] : memref<2x8x32xf32, #tpu.memory_space<vmem>>, vector<2x8x8xf32>
    tpu.vector_store %arg23[%c0_109, %c0_110, %c16_111], %315 {strides = array<i32>} : memref<2x8x32xf32, #tpu.memory_space<vmem>>, vector<2x8x8xf32>,
    %317 = vector.extract_strided_slice %250 {offsets = [0, 0, 24], sizes = [2, 8, 8], strides = [1, 1, 1]} : vector<2x8x96xf32> to vector<2x8x8xf32>
    %318 = vector.extract_strided_slice %250 {offsets = [0, 0, 56], sizes = [2, 8, 8], strides = [1, 1, 1]} : vector<2x8x96xf32> to vector<2x8x8xf32>
    %319 = vector.extract_strided_slice %250 {offsets = [0, 0, 88], sizes = [2, 8, 8], strides = [1, 1, 1]} : vector<2x8x96xf32> to vector<2x8x8xf32>
    %320 = arith.truncf %317 : vector<2x8x8xf32> to vector<2x8x8xbf16>
    %321 = arith.truncf %318 : vector<2x8x8xf32> to vector<2x8x8xbf16>
    "tpu.trace_start"() <{level = 10 : i32, message = "bqd,bkd->bqk"}> : () -> ()
    %cst_112 = arith.constant dense<0.000000e+00> : vector<2x8x8xf32>
    %322 = tpu.matmul %320, %321, %cst_112 {dimension_numbers = #tpu.dot_dimension_numbers<[2], [2], [1], [1], [0, 0, 0, 1, 1, 1], [0], [0]>} : vector<2x8x8xbf16>, vector<2x8x8xbf16>, vector<2x8x8xf32> -> vector<2x8x8xf32>
    "tpu.trace_stop"() : () -> ()
    %323 = vector.broadcast %37 : vector<2x1x8xf32> to vector<2x8x8xf32>
    %324 = arith.addf %322, %323 : vector<2x8x8xf32>
    %cst_113 = arith.constant dense<0xFF800000> : vector<2x8xf32>
    %325 = vector.multi_reduction <maximumf>, %324, %cst_113 [2] : vector<2x8x8xf32> to vector<2x8xf32>
    %326 = vector.shape_cast %325 : vector<2x8xf32> to vector<2x8x1xf32>
    %327 = vector.broadcast %326 : vector<2x8x1xf32> to vector<2x8x8xf32>
    %328 = arith.subf %324, %327 : vector<2x8x8xf32>
    %329 = math.exp %328 : vector<2x8x8xf32>
    %cst_114 = arith.constant dense<0.000000e+00> : vector<2x8xf32>
    %330 = vector.multi_reduction <add>, %329, %cst_114 [2] : vector<2x8x8xf32> to vector<2x8xf32>
    %331 = vector.shape_cast %330 : vector<2x8xf32> to vector<2x8x1xf32>
    %332 = tpu.reciprocal %331 {approx = true} : vector<2x8x1xf32> -> vector<2x8x1xf32>
    %333 = vector.broadcast %332 : vector<2x8x1xf32> to vector<2x8x8xf32>
    %334 = arith.mulf %329, %333 : vector<2x8x8xf32>
    %335 = arith.truncf %334 : vector<2x8x8xf32> to vector<2x8x8xbf16>
    %336 = arith.truncf %319 : vector<2x8x8xf32> to vector<2x8x8xbf16>
    "tpu.trace_start"() <{level = 10 : i32, message = "bqk,bkd->bqd"}> : () -> ()
    %cst_115 = arith.constant dense<0.000000e+00> : vector<2x8x8xf32>
    %337 = tpu.matmul %335, %336, %cst_115 {dimension_numbers = #tpu.dot_dimension_numbers<[2], [1], [1], [2], [0, 0, 0, 1, 1, 2], [0], [0]>} : vector<2x8x8xbf16>, vector<2x8x8xbf16>, vector<2x8x8xf32> -> vector<2x8x8xf32>
    "tpu.trace_stop"() : () -> ()
    %c0_116 = arith.constant 0 : index
    %c0_117 = arith.constant 0 : index
    %c24_118 = arith.constant 24 : index
    %338 = vector.load %arg23[%c0_116, %c0_117, %c24_118] : memref<2x8x32xf32, #tpu.memory_space<vmem>>, vector<2x8x8xf32>
    tpu.vector_store %arg23[%c0_116, %c0_117, %c24_118], %337 {strides = array<i32>} : memref<2x8x32xf32, #tpu.memory_space<vmem>>, vector<2x8x8xf32>,
    %c0_119 = arith.constant 0 : index
    %c0_120 = arith.constant 0 : index
    %c0_121 = arith.constant 0 : index
    %339 = vector.load %arg23[%c0_119, %c0_120, %c0_121] : memref<2x8x32xf32, #tpu.memory_space<vmem>>, vector<2x8x32xf32>
    %340 = vector.shape_cast %339 : vector<2x8x32xf32> to vector<16x32xf32>
    %341 = arith.truncf %340 : vector<16x32xf32> to vector<16x32xbf16>
    %342 = arith.index_cast %c1_i32 : i32 to index
    %c0_122 = arith.constant 0 : index
    %c0_123 = arith.constant 0 : index
    %343 = vector.load %arg8[%342, %c0_122, %c0_123] : memref<2x32x32xbf16, #tpu.memory_space<vmem>>, vector<1x32x32xbf16>
    %344 = vector.shape_cast %343 : vector<1x32x32xbf16> to vector<32x32xbf16>
    %cst_124 = arith.constant dense<0.000000e+00> : vector<16x32xf32>
    %345 = tpu.matmul %341, %344, %cst_124 {dimension_numbers = #tpu.dot_dimension_numbers<[1], [0], [0], [1], [0, 0, 1, 1], [], []>} : vector<16x32xbf16>, vector<32x32xbf16>, vector<16x32xf32> -> vector<16x32xf32>
    %346 = arith.index_cast %c1_i32 : i32 to index
    %c0_125 = arith.constant 0 : index
    %c0_126 = arith.constant 0 : index
    %347 = vector.load %arg9[%346, %c0_125, %c0_126] : memref<2x1x32xf32, #tpu.memory_space<vmem>>, vector<1x1x32xf32>
    %348 = vector.shape_cast %347 : vector<1x1x32xf32> to vector<1x32xf32>
    %349 = vector.broadcast %348 : vector<1x32xf32> to vector<16x32xf32>
    %350 = arith.addf %345, %349 : vector<16x32xf32>
    %351 = arith.addf %350, %239 : vector<16x32xf32>
    %352 = arith.index_cast %c1_i32 : i32 to index
    %c0_127 = arith.constant 0 : index
    %c0_128 = arith.constant 0 : index
    %353 = vector.load %arg10[%352, %c0_127, %c0_128] : memref<2x1x32xf32, #tpu.memory_space<vmem>>, vector<1x1x32xf32>
    %354 = vector.shape_cast %353 : vector<1x1x32xf32> to vector<1x32xf32>
    %355 = arith.index_cast %c1_i32 : i32 to index
    %c0_129 = arith.constant 0 : index
    %c0_130 = arith.constant 0 : index
    %356 = vector.load %arg11[%355, %c0_129, %c0_130] : memref<2x1x32xf32, #tpu.memory_space<vmem>>, vector<1x1x32xf32>
    %357 = vector.shape_cast %356 : vector<1x1x32xf32> to vector<1x32xf32>
    %cst_131 = arith.constant dense<0.000000e+00> : vector<16xf32>
    %358 = vector.multi_reduction <add>, %351, %cst_131 [1] : vector<16x32xf32> to vector<16xf32>
    %359 = vector.shape_cast %358 : vector<16xf32> to vector<16x1xf32>
    %cst_132 = arith.constant 3.200000e+01 : f32
    %360 = vector.broadcast %cst_132 : f32 to vector<16x1xf32>
    %361 = arith.divf %359, %360 : vector<16x1xf32>
    %362 = vector.broadcast %361 : vector<16x1xf32> to vector<16x32xf32>
    %363 = arith.subf %351, %362 : vector<16x32xf32>
    %364 = arith.mulf %363, %363 : vector<16x32xf32>
    %cst_133 = arith.constant dense<0.000000e+00> : vector<16xf32>
    %365 = vector.multi_reduction <add>, %364, %cst_133 [1] : vector<16x32xf32> to vector<16xf32>
    %366 = vector.shape_cast %365 : vector<16xf32> to vector<16x1xf32>
    %cst_134 = arith.constant 3.200000e+01 : f32
    %367 = vector.broadcast %cst_134 : f32 to vector<16x1xf32>
    %368 = arith.divf %366, %367 : vector<16x1xf32>
    %369 = vector.broadcast %361 : vector<16x1xf32> to vector<16x32xf32>
    %370 = arith.subf %351, %369 : vector<16x32xf32>
    %cst_135 = arith.constant 9.99999996E-13 : f32
    %371 = vector.broadcast %cst_135 : f32 to vector<16x1xf32>
    %372 = arith.addf %368, %371 : vector<16x1xf32>
    %373 = math.rsqrt %372 : vector<16x1xf32>
    %374 = vector.broadcast %373 : vector<16x1xf32> to vector<16x32xf32>
    %375 = arith.mulf %370, %374 : vector<16x32xf32>
    %376 = vector.broadcast %354 : vector<1x32xf32> to vector<16x32xf32>
    %377 = arith.mulf %375, %376 : vector<16x32xf32>
    %378 = vector.broadcast %357 : vector<1x32xf32> to vector<16x32xf32>
    %379 = arith.addf %377, %378 : vector<16x32xf32>
    %380 = arith.truncf %379 : vector<16x32xf32> to vector<16x32xbf16>
    %381 = arith.index_cast %c1_i32 : i32 to index
    %c0_136 = arith.constant 0 : index
    %c0_137 = arith.constant 0 : index
    %382 = vector.load %arg12[%381, %c0_136, %c0_137] : memref<2x32x64xbf16, #tpu.memory_space<vmem>>, vector<1x32x64xbf16>
    %383 = vector.shape_cast %382 : vector<1x32x64xbf16> to vector<32x64xbf16>
    %cst_138 = arith.constant dense<0.000000e+00> : vector<16x64xf32>
    %384 = tpu.matmul %380, %383, %cst_138 {dimension_numbers = #tpu.dot_dimension_numbers<[1], [0], [0], [1], [0, 0, 1, 1], [], []>} : vector<16x32xbf16>, vector<32x64xbf16>, vector<16x64xf32> -> vector<16x64xf32>
    %385 = arith.index_cast %c1_i32 : i32 to index
    %c0_139 = arith.constant 0 : index
    %c0_140 = arith.constant 0 : index
    %386 = vector.load %arg13[%385, %c0_139, %c0_140] : memref<2x1x64xf32, #tpu.memory_space<vmem>>, vector<1x1x64xf32>
    %387 = vector.shape_cast %386 : vector<1x1x64xf32> to vector<1x64xf32>
    %388 = vector.broadcast %387 : vector<1x64xf32> to vector<16x64xf32>
    %389 = arith.addf %384, %388 : vector<16x64xf32>
    %cst_141 = arith.constant 5.000000e-01 : f32
    %390 = vector.broadcast %cst_141 : f32 to vector<16x64xf32>
    %391 = arith.mulf %390, %389 : vector<16x64xf32>
    %cst_142 = arith.constant 4.471500e-02 : f32
    %392 = vector.broadcast %cst_142 : f32 to vector<16x64xf32>
    %393 = arith.mulf %392, %389 : vector<16x64xf32>
    %394 = arith.mulf %393, %389 : vector<16x64xf32>
    %395 = arith.mulf %394, %389 : vector<16x64xf32>
    %396 = arith.addf %389, %395 : vector<16x64xf32>
    %cst_143 = arith.constant 0.797884583 : f32
    %397 = vector.broadcast %cst_143 : f32 to vector<16x64xf32>
    %398 = arith.mulf %397, %396 : vector<16x64xf32>
    %399 = math.tanh %398 : vector<16x64xf32>
    %cst_144 = arith.constant 1.000000e+00 : f32
    %400 = vector.broadcast %cst_144 : f32 to vector<16x64xf32>
    %401 = arith.addf %400, %399 : vector<16x64xf32>
    %402 = arith.mulf %391, %401 : vector<16x64xf32>
    %403 = arith.truncf %402 : vector<16x64xf32> to vector<16x64xbf16>
    %404 = arith.index_cast %c1_i32 : i32 to index
    %c0_145 = arith.constant 0 : index
    %c0_146 = arith.constant 0 : index
    %405 = vector.load %arg14[%404, %c0_145, %c0_146] : memref<2x64x32xbf16, #tpu.memory_space<vmem>>, vector<1x64x32xbf16>
    %406 = vector.shape_cast %405 : vector<1x64x32xbf16> to vector<64x32xbf16>
    %cst_147 = arith.constant dense<0.000000e+00> : vector<16x32xf32>
    %407 = tpu.matmul %403, %406, %cst_147 {dimension_numbers = #tpu.dot_dimension_numbers<[1], [0], [0], [1], [0, 0, 1, 1], [], []>} : vector<16x64xbf16>, vector<64x32xbf16>, vector<16x32xf32> -> vector<16x32xf32>
    %408 = arith.index_cast %c1_i32 : i32 to index
    %c0_148 = arith.constant 0 : index
    %c0_149 = arith.constant 0 : index
    %409 = vector.load %arg15[%408, %c0_148, %c0_149] : memref<2x1x32xf32, #tpu.memory_space<vmem>>, vector<1x1x32xf32>
    %410 = vector.shape_cast %409 : vector<1x1x32xf32> to vector<1x32xf32>
    %411 = vector.broadcast %410 : vector<1x32xf32> to vector<16x32xf32>
    %412 = arith.addf %407, %411 : vector<16x32xf32>
    %413 = arith.addf %412, %379 : vector<16x32xf32>
    %414 = arith.index_cast %c1_i32 : i32 to index
    %c0_150 = arith.constant 0 : index
    %c0_151 = arith.constant 0 : index
    %415 = vector.load %arg16[%414, %c0_150, %c0_151] : memref<2x1x32xf32, #tpu.memory_space<vmem>>, vector<1x1x32xf32>
    %416 = vector.shape_cast %415 : vector<1x1x32xf32> to vector<1x32xf32>
    %417 = arith.index_cast %c1_i32 : i32 to index
    %c0_152 = arith.constant 0 : index
    %c0_153 = arith.constant 0 : index
    %418 = vector.load %arg17[%417, %c0_152, %c0_153] : memref<2x1x32xf32, #tpu.memory_space<vmem>>, vector<1x1x32xf32>
    %419 = vector.shape_cast %418 : vector<1x1x32xf32> to vector<1x32xf32>
    %cst_154 = arith.constant dense<0.000000e+00> : vector<16xf32>
    %420 = vector.multi_reduction <add>, %413, %cst_154 [1] : vector<16x32xf32> to vector<16xf32>
    %421 = vector.shape_cast %420 : vector<16xf32> to vector<16x1xf32>
    %cst_155 = arith.constant 3.200000e+01 : f32
    %422 = vector.broadcast %cst_155 : f32 to vector<16x1xf32>
    %423 = arith.divf %421, %422 : vector<16x1xf32>
    %424 = vector.broadcast %423 : vector<16x1xf32> to vector<16x32xf32>
    %425 = arith.subf %413, %424 : vector<16x32xf32>
    %426 = arith.mulf %425, %425 : vector<16x32xf32>
    %cst_156 = arith.constant dense<0.000000e+00> : vector<16xf32>
    %427 = vector.multi_reduction <add>, %426, %cst_156 [1] : vector<16x32xf32> to vector<16xf32>
    %428 = vector.shape_cast %427 : vector<16xf32> to vector<16x1xf32>
    %cst_157 = arith.constant 3.200000e+01 : f32
    %429 = vector.broadcast %cst_157 : f32 to vector<16x1xf32>
    %430 = arith.divf %428, %429 : vector<16x1xf32>
    %431 = vector.broadcast %423 : vector<16x1xf32> to vector<16x32xf32>
    %432 = arith.subf %413, %431 : vector<16x32xf32>
    %cst_158 = arith.constant 9.99999996E-13 : f32
    %433 = vector.broadcast %cst_158 : f32 to vector<16x1xf32>
    %434 = arith.addf %430, %433 : vector<16x1xf32>
    %435 = math.rsqrt %434 : vector<16x1xf32>
    %436 = vector.broadcast %435 : vector<16x1xf32> to vector<16x32xf32>
    %437 = arith.mulf %432, %436 : vector<16x32xf32>
    %438 = vector.broadcast %416 : vector<1x32xf32> to vector<16x32xf32>
    %439 = arith.mulf %437, %438 : vector<16x32xf32>
    %440 = vector.broadcast %419 : vector<1x32xf32> to vector<16x32xf32>
    %441 = arith.addf %439, %440 : vector<16x32xf32>
    %c2_i32 = arith.constant 2 : i32
    %442 = vector.shape_cast %441 : vector<16x32xf32> to vector<2x8x32xf32>
    %443 = vector.extract_strided_slice %442 {offsets = [0, 0, 0], sizes = [2, 1, 32], strides = [1, 1, 1]} : vector<2x8x32xf32> to vector<2x1x32xf32>
    %444 = arith.truncf %443 : vector<2x1x32xf32> to vector<2x1x32xbf16>
    %c0_159 = arith.constant 0 : index
    %c0_160 = arith.constant 0 : index
    %445 = vector.load %arg18[%c0_159, %c0_160] : memref<32x32xbf16, #tpu.memory_space<vmem>>, vector<32x32xbf16>
    "tpu.trace_start"() <{level = 10 : i32, message = "bsh,hk->bsk"}> : () -> ()
    %cst_161 = arith.constant dense<0.000000e+00> : vector<2x1x32xf32>
    %446 = tpu.matmul %444, %445, %cst_161 {dimension_numbers = #tpu.dot_dimension_numbers<[2], [0], [0, 1], [1], [0, 0, 0, 1, 1, 1], [], []>} : vector<2x1x32xbf16>, vector<32x32xbf16>, vector<2x1x32xf32> -> vector<2x1x32xf32>
    "tpu.trace_stop"() : () -> ()
    %c0_162 = arith.constant 0 : index
    %c0_163 = arith.constant 0 : index
    %447 = vector.load %arg19[%c0_162, %c0_163] : memref<1x32xf32, #tpu.memory_space<vmem>>, vector<1x32xf32>
    %448 = vector.shape_cast %447 : vector<1x32xf32> to vector<1x1x32xf32>
    %449 = vector.broadcast %448 : vector<1x1x32xf32> to vector<2x1x32xf32>
    %450 = arith.addf %446, %449 : vector<2x1x32xf32>
    %451 = math.tanh %450 : vector<2x1x32xf32>
    %452 = arith.truncf %451 : vector<2x1x32xf32> to vector<2x1x32xbf16>
    %c0_164 = arith.constant 0 : index
    %c0_165 = arith.constant 0 : index
    %453 = vector.load %arg20[%c0_164, %c0_165] : memref<32x128xbf16, #tpu.memory_space<vmem>>, vector<32x128xbf16>
    "tpu.trace_start"() <{level = 10 : i32, message = "bsh,hk->bsk"}> : () -> ()
    %cst_166 = arith.constant dense<0.000000e+00> : vector<2x1x128xf32>
    %454 = tpu.matmul %452, %453, %cst_166 {dimension_numbers = #tpu.dot_dimension_numbers<[2], [0], [0, 1], [1], [0, 0, 0, 1, 1, 1], [], []>} : vector<2x1x32xbf16>, vector<32x128xbf16>, vector<2x1x128xf32> -> vector<2x1x128xf32>
    "tpu.trace_stop"() : () -> ()
    %c0_167 = arith.constant 0 : index
    %c0_168 = arith.constant 0 : index
    %455 = vector.load %arg21[%c0_167, %c0_168] : memref<1x128xf32, #tpu.memory_space<vmem>>, vector<1x128xf32>
    %456 = vector.shape_cast %455 : vector<1x128xf32> to vector<1x1x128xf32>
    %457 = vector.broadcast %456 : vector<1x1x128xf32> to vector<2x1x128xf32>
    %458 = arith.addf %454, %457 : vector<2x1x128xf32>
    %c0_169 = arith.constant 0 : index
    %c0_170 = arith.constant 0 : index
    %c0_171 = arith.constant 0 : index
    %459 = vector.load %arg22[%c0_169, %c0_170, %c0_171] : memref<2x1x128xf32, #tpu.memory_space<vmem>>, vector<2x1x128xf32>
    tpu.vector_store %arg22[%c0_169, %c0_170, %c0_171], %458 {strides = array<i32>} : memref<2x1x128xf32, #tpu.memory_space<vmem>>, vector<2x1x128xf32>,
    return
  }
}

</mosaic_0001>

<bundles_post_ra>
// kernel: simple_transformer_forward.1
= control target key start
LH: loop header
LB: loop body
LE: loop exit
PB: predicated region body
PF: predicated region fallthrough
CT: control target
= control target key end

     0   :  { %s4462_s0 = inlined_call_operand.vmem [shape: f32[2,8,32], index: 0, kind: input, shape index: {}]   ;;  %s4463_s1 = inlined_call_operand.vmem [shape: f32[8,32], index: 1, kind: input, shape index: {}]   ;;  %s4464_s2 = inlined_call_operand.vmem [shape: f32[1,32], index: 2, kind: input, shape index: {}]   ;;  %s4465_s3 = inlined_call_operand.vmem [shape: f32[1,32], index: 3, kind: input, shape index: {}]   ;;  %s4466_s4 = inlined_call_operand.vmem [shape: f32[1,32], index: 4, kind: input, shape index: {}]   ;;  %s4467_s5 = inlined_call_operand.vmem [shape: f32[2,8], index: 5, kind: input, shape index: {}]   ;;  %s4468_s6 = inlined_call_operand.vmem [shape: bf16[2,32,96], index: 6, kind: input, shape index: {}]   ;;  %s4469_s7 = inlined_call_operand.vmem [shape: f32[2,1,96], index: 7, kind: input, shape index: {}]   ;;  %s4470_s8 = inlined_call_operand.vmem [shape: bf16[2,32,32], index: 8, kind: input, shape index: {}]   ;;  %s4471_s9 = inlined_call_operand.vmem [shape: f32[2,1,32], index: 9, kind: input, shape index: {}]   ;;  %s4472_s10 = inlined_call_operand.vmem [shape: f32[2,1,32], index: 10, kind: input, shape index: {}]   ;;  %s4473_s11 = inlined_call_operand.vmem [shape: f32[2,1,32], index: 11, kind: input, shape index: {}]   ;;  %s4474_s12 = inlined_call_operand.vmem [shape: bf16[2,32,64], index: 12, kind: input, shape index: {}]   ;;  %s4475_s13 = inlined_call_operand.vmem [shape: f32[2,1,64], index: 13, kind: input, shape index: {}]   ;;  %s4476_s14 = inlined_call_operand.vmem [shape: bf16[2,64,32], index: 14, kind: input, shape index: {}]   ;;  %s4477_s15 = inlined_call_operand.vmem [shape: f32[2,1,32], index: 15, kind: input, shape index: {}]   ;;  %s4478_s16 = inlined_call_operand.vmem [shape: f32[2,1,32], index: 16, kind: input, shape index: {}]   ;;  %s4479_s17 = inlined_call_operand.vmem [shape: f32[2,1,32], index: 17, kind: input, shape index: {}]   ;;  %s4480_s18 = inlined_call_operand.vmem [shape: bf16[32,32], index: 18, kind: input, shape index: {}]   ;;  %s4481_s19 = inlined_call_operand.vmem [shape: f32[1,32], index: 19, kind: input, shape index: {}]   ;;  %s4482_s20 = inlined_call_operand.vmem [shape: bf16[32,128], index: 20, kind: input, shape index: {}]   ;;  %s4483_s21 = inlined_call_operand.vmem [shape: f32[1,128], index: 21, kind: input, shape index: {}]   ;;  %s4484_s22 = inlined_call_operand.hbm [shape: f32[2,1,128], index: 22, kind: output, shape index: {}]  }
   0x1   :  { %4502 = sst [smem:[#allocation6_spill]] %s4462_s0 }
   0x2   :  { %4503 = sst [smem:[#allocation7_spill]] %s4463_s1 }
   0x3   :  { %4504 = sst [smem:[#allocation8_spill]] %s4464_s2 }
   0x4   :  { %4505 = sst [smem:[#allocation9_spill]] %s4465_s3 }
   0x5   :  { %4506 = sst [smem:[#allocation10_spill]] %s4466_s4 }
   0x6   :  { %4507 = sst [smem:[#allocation11_spill]] %s4467_s5 }
   0x7   :  { %4508 = sst [smem:[#allocation12_spill]] %s4468_s6 }
   0x8   :  { %4509 = sst [smem:[#allocation13_spill]] %s4479_s17 }
   0x9   :  { %s4510_s29 = sld [smem:[#allocation6_spill]]  ;;  %s4511_s17 = sld [smem:[#allocation7_spill]]  ;;  %vm89_vm0 = vcmask 261120  }
   0xa   :  { %s4512_s1 = sld [smem:[#allocation8_spill]] }
   0xf   :  { %v73_v0 = vld [vmem:[%s4510_s29] sm:$0xff]  ;;  %v74_v4 = vld [vmem:[%s4510_s29 + $0x8] sm:$0xff] }
  0x10   :  { %v75_v1 = vld [vmem:[%s4511_s17] sm:$0xff] }
  0x11   :  { %v3052_v2 = vld [vmem:[%s4512_s1] ss:$0 sm:$0xff]  ;;  %v76_v3 = vadd.f32 %v75_v1, %v73_v0  ;;  %v77_v5 = vadd.f32 %v75_v1, %v74_v4 }
  0x13   :  { %v85_v6 = vadd.f32 %v3052_v2, %v76_v3  ;;  %v86_v7 = vadd.f32 %v3052_v2, %v77_v5 }
  0x15   :  { %v90_v8 = vsel %vm89_vm0, %v85_v6, 0.0  ;;  %v93_v9 = vsel %vm89_vm0, %v86_v7, 0.0 }
  0x16   :  { %91 = vadd.xlane.f32.xlu0 %v90_v8 }
  0x1a   :  { %94 = vadd.xlane.f32.xlu0 %v93_v9 }
  0x1b   :  { %27 = vsyncpa [#allocation4], 0  ;;  %s4513_s25 = sld [smem:[#allocation12_spill]]  ;;  %v3711_v21 = vmov 0.0   ;;  %vm3712_vm1 = vmmov 0   ;;  %s4514_s28 = sld [smem:[#allocation9_spill]]  ;;  %v146_v55 = vlaneseq }
  0x1c   :  { %3266 = vmatprep.subr.bf16.mxu0 %v3711_v21  ;;  %3270 = vmatprep.mubr.msk.bf16.mxu0 %vm3712_vm1, %v3711_v21  ;;  %s4515_s4 = sld [smem:[#allocation10_spill]]  ;;  %v3056_v40 = vld [vmem:[%s4469_s7] ss:$0 sm:$0xff]  ;;  %s3713_s1 = smov 96   ;;  %vm240_vm2 = vcmask 64512   ;;  %vm365_vm3 = vcmask 1043456  }
  0x1d   :  { %3274 = vmatprep.subr.bf16.mxu1 %v3711_v21  ;;  %3276 = vmatprep.mubr.msk.bf16.mxu1 %vm3712_vm1, %v3711_v21  ;;  %v3714_v53 = vmov 1966171168   ;;  %v147_v57 = vshrl.u32 %v146_v55, 7  ;;  %s4516_s17 = sld [smem:[#allocation11_spill]]  ;;  %s3715_s6 = smov 64   ;;  %vm687_vm4 = vcmask 130112  }
  0x1e   :  { %v144_v54 = vunpack.c.l.s4 %v3714_v53  ;;  %s3716_s26 = smov 88   ;;  %s3717_s2 = smov 120   ;;  %vm918_vm5 = vcmask 195712   ;;  %vm1149_vm6 = vcmask 261312   ;;  %vm1394_vm7 = vcmask 523264  }
  0x1f   :  { %v229_v62 = vsub.s32 0, %v147_v57  ;;  %s3718_s27 = smov 56   ;;  %s3719_s3 = smov 80   ;;  %vm2821_vm8 = vcmask 1041409  }
  0x20   :  { %v145_v56 = vunpack.c.0.s8 %v144_v54  ;;  %s4500_s29 = smov 48   ;;  %s4498_s30 = smov 72  }
  0x21   :  { %v3565_v20 = vld [vmem:[%s4513_s25] sm:$0xff]   ;;  %v3566_v22 = vld [vmem:[%s4513_s25 + $0x8] sm:$0xff]   ;;  %s4492_s0 = smov 40   ;;  %s4490_s23 = smov 8  }
  0x22   :  { %3267 = vmatpush3.bf16.msra.mxu0 %v3565_v20  ;;  %v3053_v31 = vld [vmem:[%s4514_s28] ss:$0 sm:$0xff]  ;;  %v3916_v59 = vsub.s32 %v145_v56, %v147_v57  ;;  %s3720_s28 = smov 112   ;;  %s4488_s5 = smov 16  }
  0x23   :  { %3268 = vmatprep.subr.bf16.mxu0 %v3711_v21  ;;  %v3054_v35 = vld [vmem:[%s4515_s4] ss:$0 sm:$0xff]  ;;  %s4496_s4 = smov 104  }
  0x24   :  { %v3055_v58 = vld.sshfl [vmem:[%s4516_s17] sm:$0x11 pattern:$0x75316420] }
  0x25   :  { %v142_v60 = vcombine.high %v3055_v58, %v3055_v58  ;;  %v149_v61 = vrot.slane %v3055_v58, %v3916_v59 }
  0x26   :  { %3269 = vmatpush3.bf16.msra.mxu0 %v3566_v22 }
  0x27   :  { %3280 = vmatprep.subr.bf16.mxu0 %v3711_v21  ;;  %v156_v63 = vrot.slane %v142_v60, %v3916_v59  ;;  %v3920_v0 = vrot.slane %v149_v61, %v229_v62 }
  0x29   :  { %v3922_v1 = vrot.slane %v156_v63, %v229_v62 }
  0xa3   :  { %v92_v10 = vpop.xlane.xlu0 %91 }
  0xa4   :  { %v97_v11 = vmul.f32 0.03125, %v92_v10 }
  0xa6   :  { %v99_v12 = vsub.f32 %v85_v6, %v97_v11 }
  0xa7   :  { %v95_v13 = vpop.xlane.xlu0 %94 }
  0xa8   :  { %v98_v14 = vmul.f32 0.03125, %v95_v13  ;;  %v101_v15 = vmul.f32 %v99_v12, %v99_v12 }
  0xaa   :  { %v100_v16 = vsub.f32 %v86_v7, %v98_v14  ;;  %v103_v17 = vsel %vm89_vm0, %v101_v15, 0.0 }
  0xab   :  { %104 = vadd.xlane.f32.xlu1 %v103_v17 }
  0xac   :  { %v102_v18 = vmul.f32 %v100_v16, %v100_v16 }
  0xae   :  { %v106_v19 = vsel %vm89_vm0, %v102_v18, 0.0 }
  0xaf   :  { %107 = vadd.xlane.f32.xlu1 %v106_v19 }
 0x138   :  { %v105_v23 = vpop.xlane.xlu1 %104 }
 0x139   :  { %v109_v24 = vmul.f32 0.03125, %v105_v23 }
 0x13b   :  { %v111_v25 = vadd.f32 1e-12, %v109_v24 }
 0x13c   :  { %v108_v26 = vpop.xlane.xlu1 %107 }
 0x13d   :  { %3591 = vrsqrt.f32 %v111_v25  ;;  %v110_v27 = vmul.f32 0.03125, %v108_v26 }
 0x13f   :  { %v112_v28 = vadd.f32 1e-12, %v110_v27 }
 0x141   :  { %3593 = vrsqrt.f32 %v112_v28 }
 0x147   :  { %v3592_v29 = vpop.eup %3591 }
 0x148   :  { %v115_v30 = vmul.f32 %v3592_v29, %v99_v12 }
 0x14a   :  { %v123_v34 = vmul.f32 %v3053_v31, %v115_v30 }
 0x14b   :  { %v3594_v32 = vpop.eup %3593 }
 0x14c   :  { %v116_v33 = vmul.f32 %v3594_v32, %v100_v16  ;;  %v3881_v37 = vadd.f32 %v3054_v35, %v123_v34 }
 0x14e   :  { %v124_v36 = vmul.f32 %v3053_v31, %v116_v33 }
 0x150   :  { %v3883_v38 = vadd.f32 %v3054_v35, %v124_v36 }
 0x152   :  { %v157_v39 = vpack.c.bf16 %v3883_v38, %v3881_v37 }
 0x154   :  { %3271 = vmatmul.mubr.msk.bf16.vlgmr.msra.gmra.mrb[0].mxu0 %vm89_vm0, %v157_v39 }
 0x155   :  { %3282 = vmatprep.mubr.msk.bf16.mxu0 %vm3712_vm1, %v3711_v21 }
 0x227   :  { %v218_v41 = vpop.f32.mrb[0].mxu0 }
 0x228   :  { %v219_v42 = vadd.f32 %v3056_v40, %v218_v41  ;;  %v3272_v43 = vpop.f32.mrb[1].mxu0 }
 0x229   :  { %v221_v44 = vpop.f32.mrb[2].mxu0 }
 0x22a   :  { %v3893_v45 = vpack.c.bf16 %v219_v42, %v219_v42  ;;  %v222_v46 = vadd.f32 %v3056_v40, %v221_v44  ;;  %v3273_v47 = vpop.f32.mrb[3].mxu0 }
 0x22c   :  { %v3895_v48 = vpack.c.bf16 %v222_v46, %v222_v46  ;;  %238 = vrot.lane.b32.xlu0 %v3893_v45, %s3713_s1 }
 0x22e   :  { %288 = vrot.lane.b32.xlu1 %v3895_v48, %s3713_s1 }
 0x29e   :  { %v239_v49 = vpop.permute.xlu0 %238 }
 0x29f   :  { %v245_v50 = vsel %vm240_vm2, %v239_v49, 0 }
 0x2a0   :  { %3275 = vmatpush3.bf16.xpose.msra.mxu1 %v245_v50  ;;  %v289_v51 = vpop.permute.xlu1 %288 }
 0x2a1   :  { %v294_v52 = vsel %vm240_vm2, %v289_v51, 0  ;;  %3286 = vmatprep.subr.bf16.mxu1 %v3711_v21 }
 0x2a2   :  { %3281 = vmatpush3.bf16.xpose.msra.mxu0 %v294_v52 }
 0x2a3   :  { %3292 = vmatprep.subr.bf16.mxu0 %v3711_v21 }
 0x2a7   :  { %3277 = vmatmul.mubr.msk.bf16.vlgmr.msra.gmra.mrb[0].mxu1 %vm240_vm2, %v3893_v45 }
 0x2a8   :  { %3288 = vmatprep.mubr.msk.bf16.mxu1 %vm3712_vm1, %v3711_v21 }
 0x2a9   :  { %3283 = vmatmul.mubr.msk.bf16.vlgmr.msra.gmra.mrb[4].mxu0 %vm240_vm2, %v3895_v48 }
 0x2aa   :  { %3294 = vmatprep.mubr.msk.bf16.mxu0 %vm3712_vm1, %v3711_v21 }
 0x37a   :  { %v281_v2 = vpop.f32.mrb[0].mxu1 }
 0x37b   :  { %v282_v3 = vadd.f32 %v281_v2, %v3920_v0  ;;  %v3278_v4 = vpop.f32.mrb[1].mxu1 }
 0x37c   :  { %v284_v5 = vpop.f32.mrb[2].mxu1  ;;  %v330_v6 = vpop.f32.mrb[4].mxu0 }
 0x37d   :  { %v331_v7 = vadd.f32 %v330_v6, %v3922_v1  ;;  %v3279_v8 = vpop.f32.mrb[3].mxu1  ;;  %v3284_v9 = vpop.f32.mrb[5].mxu0  ;;  %v336_v10 = vsel %vm240_vm2, %v282_v3, -inf }
 0x37e   :  { %337 = vmax.xlane.f32.xlu1 %v336_v10  ;;  %v333_v11 = vpop.f32.mrb[6].mxu0 }
 0x37f   :  { %v3285_v12 = vpop.f32.mrb[7].mxu0  ;;  %v339_v13 = vsel %vm240_vm2, %v331_v7, -inf }
 0x380   :  { %340 = vmax.xlane.f32.xlu0 %v339_v13 }
 0x38f   :  { %409 = vrot.lane.b32.xlu1 %v3895_v48, %s3715_s6 }
 0x393   :  { %461 = vrot.lane.b32.xlu1 %v3893_v45, %s3716_s26 }
 0x40b   :  { %v338_v14 = vpop.xlane.xlu1 %337 }
 0x40c   :  { %v342_v15 = vsub.f32 %v282_v3, %v338_v14 }
 0x40d   :  { %v341_v16 = vpop.xlane.xlu0 %340 }
 0x40e   :  { %v344_v17 = vmul.f32 1.442695, %v342_v15  ;;  %v343_v18 = vsub.f32 %v331_v7, %v341_v16 }
 0x40f   :  { %v410_v19 = vpop.permute.xlu1 %409 }
 0x410   :  { %3595 = vpow2.f32 %v344_v17  ;;  %v346_v20 = vmul.f32 1.442695, %v343_v18  ;;  %v415_v22 = vsel %vm365_vm3, %v410_v19, 0 }
 0x411   :  { %3293 = vmatpush3.bf16.msra.mxu0 %v415_v22 }
 0x412   :  { %3597 = vpow2.f32 %v346_v20  ;;  %3304 = vmatprep.subr.bf16.mxu0 %v3711_v21 }
 0x413   :  { %v462_v27 = vpop.permute.xlu1 %461 }
 0x414   :  { %v467_v40 = vsel %vm240_vm2, %v462_v27, 0 }
 0x41a   :  { %v3596_v23 = vpop.eup %3595 }
 0x41b   :  { %v348_v24 = vsel %vm240_vm2, %v3596_v23, 0.0 }
 0x41c   :  { %v3598_v25 = vpop.eup %3597  ;;  %349 = vadd.xlane.f32.xlu0 %v348_v24 }
 0x41d   :  { %v351_v26 = vsel %vm240_vm2, %v3598_v25, 0.0 }
 0x41e   :  { %352 = vadd.xlane.f32.xlu1 %v351_v26 }
 0x42f   :  { %511 = vrot.lane.b32.xlu1 %v3895_v48, %s3716_s26 }
 0x432   :  { %360 = vrot.lane.b32.xlu0 %v3893_v45, %s3715_s6 }
 0x433   :  { %509 = vrot.lane.b32.xlu1 %v3895_v48, %s3717_s2 }
 0x436   :  { %459 = vrot.lane.b32.xlu0 %v3893_v45, %s3717_s2 }
 0x4a9   :  { %v350_v28 = vpop.xlane.xlu0 %349 }
 0x4aa   :  { %3599 = vrcp.f32 %v350_v28 }
 0x4ab   :  { %v353_v29 = vpop.xlane.xlu1 %352 }
 0x4ac   :  { %3601 = vrcp.f32 %v353_v29 }
 0x4ad   :  { %v361_v30 = vpop.permute.xlu0 %360 }
 0x4ae   :  { %v367_v31 = vsel %vm365_vm3, %v361_v30, 0 }
 0x4af   :  { %3287 = vmatpush3.bf16.msra.mxu1 %v367_v31  ;;  %v512_v39 = vpop.permute.xlu1 %511 }
 0x4b0   :  { %3298 = vmatprep.subr.bf16.mxu1 %v3711_v21  ;;  %v517_v42 = vsel %vm240_vm2, %v512_v39, 0 }
 0x4b1   :  { %v460_v43 = vpop.permute.xlu0 %459 }
 0x4b3   :  { %v510_v44 = vpop.permute.xlu1 %509 }
 0x4b4   :  { %v3600_v32 = vpop.eup %3599 }
 0x4b5   :  { %v356_v33 = vmul.f32 %v3600_v32, %v3596_v23 }
 0x4b6   :  { %v3602_v34 = vpop.eup %3601 }
 0x4b7   :  { %v357_v35 = vmul.f32 %v3602_v34, %v3598_v25  ;;  %v358_v36 = vpack.c.bf16 %v356_v33, %v356_v33 }
 0x4b9   :  { %3289 = vmatmul.mubr.msk.bf16.vlgmr.msra.gmra.mrb[4].mxu1 %vm240_vm2, %v358_v36  ;;  %v359_v41 = vpack.c.bf16 %v357_v35, %v357_v35 }
 0x4ba   :  { %3299 = vmatpush3.bf16.xpose.msra.mxu1 %v467_v40  ;;  %3300 = vmatprep.mubr.msk.bf16.mxu1 %vm3712_vm1, %v3711_v21 }
 0x4bb   :  { %3295 = vmatmul.mubr.msk.bf16.vlgmr.msra.gmra.mrb[8].mxu0 %vm240_vm2, %v359_v41  ;;  %3310 = vmatprep.subr.bf16.mxu1 %v3711_v21 }
 0x4bc   :  { %3305 = vmatpush3.bf16.xpose.msra.mxu0 %v517_v42  ;;  %3306 = vmatprep.mubr.msk.bf16.mxu0 %vm3712_vm1, %v3711_v21 }
 0x4bd   :  { %3316 = vmatprep.subr.bf16.mxu0 %v3711_v21 }
 0x4c1   :  { %3301 = vmatmul.mubr.msk.bf16.vlgmr.msra.gmra.mrb[8].mxu1 %vm240_vm2, %v460_v43 }
 0x4c2   :  { %3312 = vmatprep.mubr.msk.bf16.mxu1 %vm3712_vm1, %v3711_v21 }
 0x4c3   :  { %3307 = vmatmul.mubr.msk.bf16.vlgmr.msra.gmra.mrb[12].mxu0 %vm240_vm2, %v510_v44 }
 0x4c4   :  { %3318 = vmatprep.mubr.msk.bf16.mxu0 %vm3712_vm1, %v3711_v21 }
 0x58c   :  { %v403_v46 = vpop.f32.mrb[4].mxu1 }
 0x58d   :  { %457 = vst.msk [vmem:[#allocation2] sm:$0xff] %vm240_vm2, %v403_v46  ;;  %v3290_v47 = vpop.f32.mrb[5].mxu1 }
 0x58e   :  { %v406_v49 = vpop.f32.mrb[6].mxu1  ;;  %v451_v50 = vpop.f32.mrb[8].mxu0 }
 0x58f   :  { %458 = vst.msk [vmem:[#allocation2 + $0x8] sm:$0xff] %vm240_vm2, %v451_v50  ;;  %v3291_v51 = vpop.f32.mrb[7].mxu1  ;;  %v3296_v52 = vpop.f32.mrb[9].mxu0 }
 0x590   :  { %v454_v53 = vpop.f32.mrb[10].mxu0 }
 0x591   :  { %v3297_v54 = vpop.f32.mrb[11].mxu0 }
 0x594   :  { %v503_v55 = vpop.f32.mrb[8].mxu1 }
 0x595   :  { %v504_v56 = vadd.f32 %v503_v55, %v3920_v0  ;;  %v3302_v57 = vpop.f32.mrb[9].mxu1 }
 0x596   :  { %v506_v58 = vpop.f32.mrb[10].mxu1  ;;  %v553_v60 = vpop.f32.mrb[12].mxu0 }
 0x597   :  { %v554_v61 = vadd.f32 %v553_v60, %v3922_v1  ;;  %v3303_v62 = vpop.f32.mrb[11].mxu1  ;;  %v3308_v63 = vpop.f32.mrb[13].mxu0  ;;  %v559_v2 = vsel %vm240_vm2, %v504_v56, -inf }
 0x598   :  { %560 = vmax.xlane.f32.xlu0 %v559_v2  ;;  %v556_v3 = vpop.f32.mrb[14].mxu0 }
 0x599   :  { %v3309_v4 = vpop.f32.mrb[15].mxu0  ;;  %v562_v5 = vsel %vm240_vm2, %v554_v61, -inf }
 0x59a   :  { %563 = vmax.xlane.f32.xlu1 %v562_v5 }
 0x5ab   :  { %631 = vrot.lane.b32.xlu1 %v3895_v48, %s3718_s27 }
 0x5af   :  { %692 = vrot.lane.b32.xlu1 %v3893_v45, %s3719_s3 }
 0x5b3   :  { %742 = vrot.lane.b32.xlu1 %v3895_v48, %s3719_s3 }
 0x5b7   :  { %740 = vrot.lane.b32.xlu1 %v3895_v48, %s3720_s28 }
 0x625   :  { %v561_v6 = vpop.xlane.xlu0 %560 }
 0x626   :  { %v565_v7 = vsub.f32 %v504_v56, %v561_v6 }
 0x627   :  { %v564_v8 = vpop.xlane.xlu1 %563 }
 0x628   :  { %v567_v9 = vmul.f32 1.442695, %v565_v7  ;;  %v566_v10 = vsub.f32 %v554_v61, %v564_v8 }
 0x62a   :  { %3603 = vpow2.f32 %v567_v9  ;;  %v569_v11 = vmul.f32 1.442695, %v566_v10 }
 0x62b   :  { %v632_v12 = vpop.permute.xlu1 %631 }
 0x62c   :  { %3605 = vpow2.f32 %v569_v11  ;;  %v637_v13 = vsel %vm365_vm3, %v632_v12, 0 }
 0x62d   :  { %3317 = vmatpush3.bf16.msra.mxu0 %v637_v13 }
 0x62e   :  { %3328 = vmatprep.subr.bf16.mxu0 %v3711_v21 }
 0x62f   :  { %v693_v24 = vpop.permute.xlu1 %692 }
 0x630   :  { %v698_v30 = vsel %vm240_vm2, %v693_v24, 0 }
 0x633   :  { %v743_v29 = vpop.permute.xlu1 %742 }
 0x634   :  { %v3604_v14 = vpop.eup %3603  ;;  %v748_v32 = vsel %vm240_vm2, %v743_v29, 0 }
 0x635   :  { %v571_v15 = vsel %vm240_vm2, %v3604_v14, 0.0 }
 0x636   :  { %v3606_v16 = vpop.eup %3605  ;;  %572 = vadd.xlane.f32.xlu0 %v571_v15 }
 0x637   :  { %v574_v17 = vsel %vm240_vm2, %v3606_v16, 0.0  ;;  %v741_v34 = vpop.permute.xlu1 %740 }
 0x63a   :  { %575 = vadd.xlane.f32.xlu0 %v574_v17 }
 0x650   :  { %583 = vrot.lane.b32.xlu0 %v3893_v45, %s3718_s27 }
 0x654   :  { %690 = vrot.lane.b32.xlu0 %v3893_v45, %s3720_s28 }
 0x6c3   :  { %v573_v18 = vpop.xlane.xlu0 %572 }
 0x6c4   :  { %3607 = vrcp.f32 %v573_v18 }
 0x6c7   :  { %v576_v19 = vpop.xlane.xlu0 %575 }
 0x6c8   :  { %3609 = vrcp.f32 %v576_v19 }
 0x6cb   :  { %v584_v20 = vpop.permute.xlu0 %583 }
 0x6cc   :  { %v589_v22 = vsel %vm365_vm3, %v584_v20, 0 }
 0x6cd   :  { %3311 = vmatpush3.bf16.msra.mxu1 %v589_v22 }
 0x6ce   :  { %v3608_v23 = vpop.eup %3607  ;;  %3322 = vmatprep.subr.bf16.mxu1 %v3711_v21 }
 0x6cf   :  { %v579_v25 = vmul.f32 %v3608_v23, %v3604_v14  ;;  %v691_v33 = vpop.permute.xlu0 %690 }
 0x6d1   :  { %v581_v26 = vpack.c.bf16 %v579_v25, %v579_v25 }
 0x6d2   :  { %v3610_v27 = vpop.eup %3609 }
 0x6d3   :  { %v580_v28 = vmul.f32 %v3610_v27, %v3606_v16  ;;  %3313 = vmatmul.mubr.msk.bf16.vlgmr.msra.gmra.mrb[12].mxu1 %vm240_vm2, %v581_v26 }
 0x6d4   :  { %3324 = vmatprep.mubr.msk.bf16.mxu1 %vm3712_vm1, %v3711_v21 }
 0x6d5   :  { %v582_v31 = vpack.c.bf16 %v580_v28, %v580_v28 }
 0x6d6   :  { %3323 = vmatpush3.bf16.xpose.msra.mxu1 %v698_v30 }
 0x6d7   :  { %3319 = vmatmul.mubr.msk.bf16.vlgmr.msra.gmra.mrb[16].mxu0 %vm240_vm2, %v582_v31  ;;  %3334 = vmatprep.subr.bf16.mxu1 %v3711_v21 }
 0x6d8   :  { %3329 = vmatpush3.bf16.xpose.msra.mxu0 %v748_v32  ;;  %3330 = vmatprep.mubr.msk.bf16.mxu0 %vm3712_vm1, %v3711_v21 }
 0x6d9   :  { %3340 = vmatprep.subr.bf16.mxu0 %v3711_v21 }
 0x6dd   :  { %3325 = vmatmul.mubr.msk.bf16.vlgmr.msra.gmra.mrb[16].mxu1 %vm240_vm2, %v691_v33 }
 0x6de   :  { %3336 = vmatprep.mubr.msk.bf16.mxu1 %vm3712_vm1, %v3711_v21 }
 0x6df   :  { %3331 = vmatmul.mubr.msk.bf16.vlgmr.msra.gmra.mrb[20].mxu0 %vm240_vm2, %v741_v34 }
 0x6e0   :  { %3342 = vmatprep.mubr.msk.bf16.mxu0 %vm3712_vm1, %v3711_v21 }
 0x7a6   :  { %v4002_v35 = vpop.f32.mrb[12].mxu1 }
 0x7a7   :  { %v3314_v36 = vpop.f32.mrb[13].mxu1 }
 0x7a8   :  { %v628_v39 = vpop.f32.mrb[14].mxu1 }
 0x7a9   :  { %v3315_v40 = vpop.f32.mrb[15].mxu1 }
 0x7aa   :  { %v4004_v41 = vpop.f32.mrb[16].mxu0 }
 0x7ab   :  { %v3320_v42 = vpop.f32.mrb[17].mxu0 }
 0x7ac   :  { %v676_v43 = vpop.f32.mrb[18].mxu0 }
 0x7ad   :  { %v3321_v44 = vpop.f32.mrb[19].mxu0 }
 0x7b0   :  { %v734_v46 = vpop.f32.mrb[16].mxu1 }
 0x7b1   :  { %v735_v47 = vadd.f32 %v734_v46, %v3920_v0  ;;  %v3326_v49 = vpop.f32.mrb[17].mxu1 }
 0x7b2   :  { %v737_v50 = vpop.f32.mrb[18].mxu1  ;;  %v784_v51 = vpop.f32.mrb[20].mxu0 }
 0x7b3   :  { %v785_v52 = vadd.f32 %v784_v51, %v3922_v1  ;;  %v3327_v53 = vpop.f32.mrb[19].mxu1  ;;  %v3332_v54 = vpop.f32.mrb[21].mxu0  ;;  %v790_v55 = vsel %vm240_vm2, %v735_v47, -inf }
 0x7b4   :  { %791 = vmax.xlane.f32.xlu0 %v790_v55  ;;  %v787_v56 = vpop.f32.mrb[22].mxu0 }
 0x7b5   :  { %v3333_v57 = vpop.f32.mrb[23].mxu0  ;;  %v793_v58 = vsel %vm240_vm2, %v785_v52, -inf }
 0x7b6   :  { %794 = vmax.xlane.f32.xlu1 %v793_v58 }
 0x7c7   :  { %862 = vrot.lane.b32.xlu1 %v3895_v48, %s4500_s29 }
 0x7cb   :  { %923 = vrot.lane.b32.xlu1 %v3893_v45, %s4498_s30 }
 0x7cf   :  { %973 = vrot.lane.b32.xlu1 %v3895_v48, %s4498_s30  ;;  %s4517_s30 = sld [smem:[#allocation13_spill]] }
 0x7d3   :  { %971 = vrot.lane.b32.xlu1 %v3895_v48, %s4496_s4 }
 0x841   :  { %v792_v60 = vpop.xlane.xlu0 %791 }
 0x842   :  { %v796_v61 = vsub.f32 %v735_v47, %v792_v60 }
 0x843   :  { %v795_v62 = vpop.xlane.xlu1 %794 }
 0x844   :  { %v798_v63 = vmul.f32 1.442695, %v796_v61  ;;  %v797_v2 = vsub.f32 %v785_v52, %v795_v62 }
 0x846   :  { %3611 = vpow2.f32 %v798_v63  ;;  %v800_v3 = vmul.f32 1.442695, %v797_v2 }
 0x847   :  { %v863_v4 = vpop.permute.xlu1 %862 }
 0x848   :  { %3613 = vpow2.f32 %v800_v3  ;;  %v868_v5 = vsel %vm365_vm3, %v863_v4, 0 }
 0x849   :  { %3341 = vmatpush3.bf16.msra.mxu0 %v868_v5 }
 0x84a   :  { %3352 = vmatprep.subr.bf16.mxu0 %v3711_v21 }
 0x84b   :  { %v924_v15 = vpop.permute.xlu1 %923 }
 0x84c   :  { %v929_v22 = vsel %vm240_vm2, %v924_v15, 0  ;;  %v3568_v15 = vld [vmem:[%s4470_s8 + $0x8] sm:$0xff]  }
 0x84f   :  { %v974_v20 = vpop.permute.xlu1 %973 }
 0x850   :  { %v3612_v6 = vpop.eup %3611  ;;  %v979_v24 = vsel %vm240_vm2, %v974_v20, 0 }
 0x851   :  { %v802_v7 = vsel %vm240_vm2, %v3612_v6, 0.0 }
 0x852   :  { %v3614_v8 = vpop.eup %3613  ;;  %803 = vadd.xlane.f32.xlu0 %v802_v7 }
 0x853   :  { %v805_v9 = vsel %vm240_vm2, %v3614_v8, 0.0  ;;  %v972_v26 = vpop.permute.xlu1 %971 }
 0x856   :  { %806 = vadd.xlane.f32.xlu0 %v805_v9 }
 0x86c   :  { %814 = vrot.lane.b32.xlu0 %v3893_v45, %s4500_s29 }
 0x870   :  { %921 = vrot.lane.b32.xlu0 %v3893_v45, %s4496_s4  ;;  %s4524_s4 = smov 24  }
 0x8df   :  { %v804_v10 = vpop.xlane.xlu0 %803 }
 0x8e0   :  { %3615 = vrcp.f32 %v804_v10 }
 0x8e3   :  { %v807_v11 = vpop.xlane.xlu0 %806 }
 0x8e4   :  { %3617 = vrcp.f32 %v807_v11 }
 0x8e7   :  { %v815_v12 = vpop.permute.xlu0 %814 }
 0x8e8   :  { %v820_v13 = vsel %vm365_vm3, %v815_v12, 0 }
 0x8e9   :  { %3335 = vmatpush3.bf16.msra.mxu1 %v820_v13 }
 0x8ea   :  { %v3616_v14 = vpop.eup %3615  ;;  %3346 = vmatprep.subr.bf16.mxu1 %v3711_v21 }
 0x8eb   :  { %v810_v16 = vmul.f32 %v3616_v14, %v3612_v6  ;;  %v922_v25 = vpop.permute.xlu0 %921  ;;  %v3567_v14 = vld [vmem:[%s4470_s8] sm:$0xff]  }
 0x8ed   :  { %v812_v17 = vpack.c.bf16 %v810_v16, %v810_v16 }
 0x8ee   :  { %v3618_v18 = vpop.eup %3617 }
 0x8ef   :  { %v811_v19 = vmul.f32 %v3618_v18, %v3614_v8  ;;  %3337 = vmatmul.mubr.msk.bf16.vlgmr.msra.gmra.mrb[20].mxu1 %vm240_vm2, %v812_v17 }
 0x8f0   :  { %3348 = vmatprep.mubr.msk.bf16.mxu1 %vm3712_vm1, %v3711_v21 }
 0x8f1   :  { %v813_v23 = vpack.c.bf16 %v811_v19, %v811_v19 }
 0x8f2   :  { %3347 = vmatpush3.bf16.xpose.msra.mxu1 %v929_v22 }
 0x8f3   :  { %3343 = vmatmul.mubr.msk.bf16.vlgmr.msra.gmra.mrb[24].mxu0 %vm240_vm2, %v813_v23  ;;  %3358 = vmatprep.subr.bf16.mxu1 %v3711_v21 }
 0x8f4   :  { %3353 = vmatpush3.bf16.xpose.msra.mxu0 %v979_v24  ;;  %3354 = vmatprep.mubr.msk.bf16.mxu0 %vm3712_vm1, %v3711_v21 }
 0x8f5   :  { %3364 = vmatprep.subr.bf16.mxu0 %v3711_v21 }
 0x8f9   :  { %3349 = vmatmul.mubr.msk.bf16.vlgmr.msra.gmra.mrb[24].mxu1 %vm240_vm2, %v922_v25 }
 0x8fa   :  { %3360 = vmatprep.mubr.msk.bf16.mxu1 %vm3712_vm1, %v3711_v21 }
 0x8fb   :  { %3355 = vmatmul.mubr.msk.bf16.vlgmr.msra.gmra.mrb[28].mxu0 %vm240_vm2, %v972_v26 }
 0x8fc   :  { %3366 = vmatprep.mubr.msk.bf16.mxu0 %vm3712_vm1, %v3711_v21 }
 0x9c2   :  { %v856_v27 = vpop.f32.mrb[20].mxu1 }
 0x9c3   :  { %v3338_v28 = vpop.f32.mrb[21].mxu1 }
 0x9c4   :  { %v859_v29 = vpop.f32.mrb[22].mxu1 }
 0x9c5   :  { %v3339_v30 = vpop.f32.mrb[23].mxu1 }
 0x9c6   :  { %v904_v31 = vpop.f32.mrb[24].mxu0  ;;  %v3076_v30 = vld [vmem:[%s4471_s9] ss:$0 sm:$0xff] }
 0x9c7   :  { %v3344_v32 = vpop.f32.mrb[25].mxu0 }
 0x9c8   :  { %v907_v33 = vpop.f32.mrb[26].mxu0 }
 0x9c9   :  { %v3345_v34 = vpop.f32.mrb[27].mxu0 }
 0x9cc   :  { %v965_v36 = vpop.f32.mrb[24].mxu1 }
 0x9cd   :  { %v966_v39 = vadd.f32 %v965_v36, %v3920_v0  ;;  %v3350_v40 = vpop.f32.mrb[25].mxu1 }
 0x9ce   :  { %v968_v42 = vpop.f32.mrb[26].mxu1  ;;  %v1015_v43 = vpop.f32.mrb[28].mxu0 }
 0x9cf   :  { %v1016_v44 = vadd.f32 %v1015_v43, %v3922_v1  ;;  %v3351_v46 = vpop.f32.mrb[27].mxu1  ;;  %v3356_v47 = vpop.f32.mrb[29].mxu0  ;;  %v1021_v49 = vsel %vm240_vm2, %v966_v39, -inf }
 0x9d0   :  { %1022 = vmax.xlane.f32.xlu0 %v1021_v49  ;;  %v1018_v50 = vpop.f32.mrb[30].mxu0 }
 0x9d1   :  { %v3357_v51 = vpop.f32.mrb[31].mxu0  ;;  %v1024_v52 = vsel %vm240_vm2, %v1016_v44, -inf }
 0x9d2   :  { %1025 = vmax.xlane.f32.xlu1 %v1024_v52 }
 0x9e3   :  { %1093 = vrot.lane.b32.xlu1 %v3895_v48, %s4492_s0 }
 0x9e7   :  { %681 = vrot.lane.b32.xlu1 %v4002_v35, %s4490_s23 }
 0x9eb   :  { %683 = vrot.lane.b32.xlu1 %v4004_v41, %s4490_s23 }
 0x9ef   :  { %914 = vrot.lane.b32.xlu1 %v904_v31, %s4488_s5 }
 0xa5d   :  { %v1023_v53 = vpop.xlane.xlu0 %1022 }
 0xa5e   :  { %v1027_v54 = vsub.f32 %v966_v39, %v1023_v53 }
 0xa5f   :  { %v1026_v55 = vpop.xlane.xlu1 %1025 }
 0xa60   :  { %v1029_v56 = vmul.f32 1.442695, %v1027_v54  ;;  %v1028_v57 = vsub.f32 %v1016_v44, %v1026_v55 }
 0xa62   :  { %3619 = vpow2.f32 %v1029_v56  ;;  %v1031_v58 = vmul.f32 1.442695, %v1028_v57  ;;  %v3570_v56 = vld [vmem:[%s4474_s12 + $0x8] sm:$0xff]  }
 0xa63   :  { %v1094_v60 = vpop.permute.xlu1 %1093 }
 0xa64   :  { %3621 = vpow2.f32 %v1031_v58  ;;  %v1099_v48 = vsel %vm365_vm3, %v1094_v60, 0 }
 0xa65   :  { %3365 = vmatpush3.bf16.msra.mxu0 %v1099_v48 }
 0xa66   :  { %3378 = vmatprep.subr.bf16.mxu0 %v3711_v21 }
 0xa67   :  { %v682_v35 = vpop.permute.xlu1 %681 }
 0xa68   :  { %688 = vst.msk [vmem:[#allocation2] sm:$0xff] %vm687_vm4, %v682_v35 }
 0xa6b   :  { %v684_v41 = vpop.permute.xlu1 %683 }
 0xa6c   :  { %v3620_v61 = vpop.eup %3619  ;;  %689 = vst.msk [vmem:[#allocation2 + $0x8] sm:$0xff] %vm687_vm4, %v684_v41 }
 0xa6d   :  { %v1033_v62 = vsel %vm240_vm2, %v3620_v61, 0.0 }
 0xa6e   :  { %v3622_v63 = vpop.eup %3621  ;;  %1034 = vadd.xlane.f32.xlu0 %v1033_v62 }
 0xa6f   :  { %v915_v2 = vpop.permute.xlu1 %914  ;;  %v1036_v3 = vsel %vm240_vm2, %v3622_v63, 0.0 }
 0xa70   :  { %920 = vst.msk [vmem:[#allocation2 + $0x8] sm:$0xff] %vm918_vm5, %v915_v2 }
 0xa72   :  { %1037 = vadd.xlane.f32.xlu0 %v1036_v3 }
 0xa88   :  { %1045 = vrot.lane.b32.xlu0 %v3893_v45, %s4492_s0  ;;  %s4494_s0 = smov 24  }
 0xa8c   :  { %912 = vrot.lane.b32.xlu0 %v856_v27, %s4488_s5 }
 0xafb   :  { %v1035_v4 = vpop.xlane.xlu0 %1034 }
 0xafc   :  { %3623 = vrcp.f32 %v1035_v4 }
 0xaff   :  { %v1038_v5 = vpop.xlane.xlu0 %1037 }
 0xb00   :  { %3625 = vrcp.f32 %v1038_v5  ;;  %v3081_v5 = vld [vmem:[%s4473_s11] ss:$0 sm:$0xff] }
 0xb03   :  { %v1046_v6 = vpop.permute.xlu0 %1045 }
 0xb04   :  { %v1051_v7 = vsel %vm365_vm3, %v1046_v6, 0 }
 0xb05   :  { %3359 = vmatpush3.bf16.msra.mxu1 %v1051_v7 }
 0xb06   :  { %v3624_v8 = vpop.eup %3623  ;;  %3370 = vmatprep.subr.bf16.mxu1 %v3711_v21 }
 0xb07   :  { %v1041_v9 = vmul.f32 %v3624_v8, %v3620_v61  ;;  %v913_v10 = vpop.permute.xlu0 %912 }
 0xb08   :  { %919 = vst.msk [vmem:[#allocation2] sm:$0xff] %vm918_vm5, %v913_v10  ;;  %v3571_v10 = vld [vmem:[%s4476_s14] sm:$0xff]  }
 0xb09   :  { %v1043_v11 = vpack.c.bf16 %v1041_v9, %v1041_v9 }
 0xb0a   :  { %v3626_v12 = vpop.eup %3625 }
 0xb0b   :  { %v1042_v45 = vmul.f32 %v3626_v12, %v3622_v63  ;;  %3361 = vmatmul.mubr.msk.bf16.vlgmr.msra.gmra.mrb[28].mxu1 %vm240_vm2, %v1043_v11  ;;  %v3080_v63 = vld [vmem:[%s4472_s10] ss:$0 sm:$0xff]  ;;  %v3572_v11 = vld [vmem:[%s4476_s14 + $0x8] sm:$0xff]   ;;  %v3573_v12 = vld [vmem:[%s4476_s14 + $0x10] sm:$0xff]  }
 0xb0c   :  { %3374 = vmatprep.mubr.msk.bf16.mxu1 %vm3712_vm1, %v3711_v21  ;;  %3371 = vmatpush3.bf16.msra.mxu1 %v3567_v14 }
 0xb0d   :  { %v1044_v13 = vpack.c.bf16 %v1042_v45, %v1042_v45  ;;  %3372 = vmatprep.subr.bf16.mxu1 %v3711_v21  ;;  %v3574_v45 = vld [vmem:[%s4476_s14 + $0x18] sm:$0xff]  }
 0xb0f   :  { %3367 = vmatmul.mubr.msk.bf16.vlgmr.msra.gmra.mrb[32].mxu0 %vm240_vm2, %v1044_v13  ;;  %v3082_v13 = vld [vmem:[%s4475_s13] ss:$0 sm:$0xff] }
 0xb10   :  { %3382 = vmatprep.mubr.msk.bf16.mxu0 %vm3712_vm1, %v3711_v21  ;;  %3373 = vmatpush3.bf16.msra.mxu1 %v3568_v15 }
 0xb11   :  { %3386 = vmatprep.subr.bf16.mxu1 %v3711_v21 }
 0xbde   :  { %v1087_v16 = vpop.f32.mrb[28].mxu1 }
 0xbdf   :  { %1143 = vrot.lane.b32.xlu0 %v1087_v16, %s4494_s0  ;;  %v3362_v17 = vpop.f32.mrb[29].mxu1 }
 0xbe0   :  { %v1090_v18 = vpop.f32.mrb[30].mxu1 }
 0xbe1   :  { %v3363_v19 = vpop.f32.mrb[31].mxu1 }
 0xbe2   :  { %v1135_v20 = vpop.f32.mrb[32].mxu0 }
 0xbe3   :  { %1145 = vrot.lane.b32.xlu1 %v1135_v20, %s4494_s0  ;;  %v3368_v22 = vpop.f32.mrb[33].mxu0 }
 0xbe4   :  { %v1138_v23 = vpop.f32.mrb[34].mxu0 }
 0xbe5   :  { %v3369_v24 = vpop.f32.mrb[35].mxu0 }
 0xc51   :  { %v1144_v25 = vpop.permute.xlu0 %1143 }
 0xc52   :  { %1150 = vst.msk [vmem:[#allocation2] sm:$0xff] %vm1149_vm6, %v1144_v25 }
 0xc55   :  { %v1146_v26 = vpop.permute.xlu1 %1145 }
 0xc56   :  { %1151 = vst.msk [vmem:[#allocation2 + $0x8] sm:$0xff] %vm1149_vm6, %v1146_v26 }
 0xc59   :  { %v1152_v27 = vld [vmem:[#allocation2] sm:$0xff] }
 0xc5d   :  { %v1153_v28 = vld [vmem:[#allocation2 + $0x8] sm:$0xff] }
 0xc5e   :  { %v1154_v29 = vpack.c.bf16 %v1153_v28, %v1152_v27 }
 0xc60   :  { %3375 = vmatmul.mubr.msk.bf16.vlgmr.msra.gmra.mrb[32].mxu1 %vm89_vm0, %v1154_v29 }
 0xc61   :  { %3394 = vmatprep.mubr.msk.bf16.mxu1 %vm3712_vm1, %v3711_v21  ;;  %3387 = vmatpush3.bf16.msra.mxu1 %v3571_v10  ;;  %v3092_v10 = vld [vmem:[%s4478_s16] ss:$0 sm:$0xff] }
 0xc62   :  { %3388 = vmatprep.subr.bf16.mxu1 %v3711_v21 }
 0xc65   :  { %3389 = vmatpush3.bf16.msra.mxu1 %v3572_v11 }
 0xc66   :  { %3390 = vmatprep.subr.bf16.mxu1 %v3711_v21 }
 0xc69   :  { %3391 = vmatpush3.bf16.msra.mxu1 %v3573_v12 }
 0xc6a   :  { %3392 = vmatprep.subr.bf16.mxu1 %v3711_v21 }
 0xc6d   :  { %3393 = vmatpush3.bf16.msra.mxu1 %v3574_v45 }
 0xc6e   :  { %3412 = vmatprep.subr.bf16.mxu1 %v3711_v21 }
 0xd33   :  { %v1215_v31 = vpop.f32.mrb[32].mxu1 }
 0xd34   :  { %v1216_v32 = vadd.f32 %v3076_v30, %v1215_v31  ;;  %v3376_v33 = vpop.f32.mrb[33].mxu1 }
 0xd35   :  { %v1218_v34 = vpop.f32.mrb[34].mxu1 }
 0xd36   :  { %v1219_v36 = vadd.f32 %v3076_v30, %v1218_v34  ;;  %v3377_v39 = vpop.f32.mrb[35].mxu1  ;;  %v1222_v40 = vadd.f32 %v1216_v32, %v3881_v37 }
 0xd38   :  { %v1226_v42 = vsel %vm89_vm0, %v1222_v40, 0.0  ;;  %v1223_v43 = vadd.f32 %v1219_v36, %v3883_v38  ;;  %v3569_v38 = vld [vmem:[%s4474_s12] sm:$0xff]  }
 0xd39   :  { %1227 = vadd.xlane.f32.xlu0 %v1226_v42  ;;  %3379 = vmatpush3.bf16.msra.mxu0 %v3569_v38 }
 0xd3a   :  { %v1229_v44 = vsel %vm89_vm0, %v1223_v43, 0.0  ;;  %3380 = vmatprep.subr.bf16.mxu0 %v3711_v21 }
 0xd3b   :  { %1230 = vadd.xlane.f32.xlu1 %v1229_v44  ;;  %v3086_v44 = vld [vmem:[%s4477_s15] ss:$0 sm:$0xff] }
 0xd3d   :  { %3381 = vmatpush3.bf16.msra.mxu0 %v3570_v56 }
 0xd3e   :  { %3398 = vmatprep.subr.bf16.mxu0 %v3711_v21 }
 0xdc6   :  { %v1228_v46 = vpop.xlane.xlu0 %1227 }
 0xdc7   :  { %v1232_v47 = vmul.f32 0.03125, %v1228_v46 }
 0xdc8   :  { %v1231_v49 = vpop.xlane.xlu1 %1230 }
 0xdc9   :  { %v1234_v50 = vsub.f32 %v1222_v40, %v1232_v47  ;;  %v1233_v51 = vmul.f32 0.03125, %v1231_v49 }
 0xdcb   :  { %v1235_v52 = vsub.f32 %v1223_v43, %v1233_v51  ;;  %v1236_v53 = vmul.f32 %v1234_v50, %v1234_v50 }
 0xdcd   :  { %v1238_v54 = vsel %vm89_vm0, %v1236_v53, 0.0  ;;  %v1237_v55 = vmul.f32 %v1235_v52, %v1235_v52 }
 0xdce   :  { %1239 = vadd.xlane.f32.xlu0 %v1238_v54 }
 0xdcf   :  { %v1241_v37 = vsel %vm89_vm0, %v1237_v55, 0.0 }
 0xdd2   :  { %1242 = vadd.xlane.f32.xlu0 %v1241_v37 }
 0xe5b   :  { %v1240_v57 = vpop.xlane.xlu0 %1239 }
 0xe5c   :  { %v1244_v58 = vmul.f32 0.03125, %v1240_v57 }
 0xe5e   :  { %v1246_v60 = vadd.f32 1e-12, %v1244_v58 }
 0xe5f   :  { %v1243_v48 = vpop.xlane.xlu0 %1242 }
 0xe60   :  { %3627 = vrsqrt.f32 %v1246_v60  ;;  %v1245_v35 = vmul.f32 0.03125, %v1243_v48 }
 0xe62   :  { %v1247_v41 = vadd.f32 1e-12, %v1245_v35 }
 0xe64   :  { %3629 = vrsqrt.f32 %v1247_v41 }
 0xe6a   :  { %v3628_v61 = vpop.eup %3627 }
 0xe6b   :  { %v1250_v62 = vmul.f32 %v3628_v61, %v1234_v50 }
 0xe6d   :  { %v1258_v3 = vmul.f32 %v3080_v63, %v1250_v62 }
 0xe6e   :  { %v3630_v2 = vpop.eup %3629 }
 0xe6f   :  { %v1251_v4 = vmul.f32 %v3630_v2, %v1235_v52  ;;  %v1266_v7 = vadd.f32 %v3081_v5, %v1258_v3  ;;  %v3576_v2 = vld [vmem:[%s4513_s25 + $0x18] sm:$0xff]  }
 0xe71   :  { %v1259_v6 = vmul.f32 %v3080_v63, %v1251_v4  ;;  %v3575_v63 = vld [vmem:[%s4513_s25 + $0x10] sm:$0xff]  }
 0xe73   :  { %v1267_v8 = vadd.f32 %v3081_v5, %v1259_v6 }
 0xe75   :  { %v1268_v9 = vpack.c.bf16 %v1267_v8, %v1266_v7 }
 0xe77   :  { %3383 = vmatmul.mubr.msk.bf16.vlgmr.msra.gmra.mrb[36].mxu0 %vm89_vm0, %v1268_v9 }
 0xe78   :  { %3402 = vmatprep.mubr.msk.bf16.mxu0 %vm3712_vm1, %v3711_v21  ;;  %3399 = vmatpush3.bf16.msra.mxu0 %v3575_v63 }
 0xe79   :  { %3400 = vmatprep.subr.bf16.mxu0 %v3711_v21 }
 0xe7c   :  { %3401 = vmatpush3.bf16.msra.mxu0 %v3576_v2 }
 0xe7d   :  { %3406 = vmatprep.subr.bf16.mxu0 %v3711_v21 }
 0xf4a   :  { %v1329_v14 = vpop.f32.mrb[36].mxu0 }
 0xf4b   :  { %v1330_v15 = vadd.f32 %v3082_v13, %v1329_v14  ;;  %v3384_v16 = vpop.f32.mrb[37].mxu0  ;;  %v3093_v14 = vld [vmem:[%s4517_s30] ss:$0 sm:$0xff] }
 0xf4c   :  { %v1332_v17 = vpop.f32.mrb[38].mxu0 }
 0xf4d   :  { %v1338_v18 = vmul.f32 0.044715, %v1330_v15  ;;  %v1333_v19 = vadd.f32 %v3082_v13, %v1332_v17  ;;  %v3385_v20 = vpop.f32.mrb[39].mxu0  ;;  %v1336_v34 = vmul.f32 0.5, %v1330_v15 }
 0xf4f   :  { %v1340_v22 = vmul.f32 %v1338_v18, %v1330_v15  ;;  %v1339_v23 = vmul.f32 0.044715, %v1333_v19  ;;  %v1337_v36 = vmul.f32 0.5, %v1333_v19 }
 0xf51   :  { %v1342_v24 = vmul.f32 %v1340_v22, %v1330_v15  ;;  %v1341_v25 = vmul.f32 %v1339_v23, %v1333_v19 }
 0xf53   :  { %v1344_v26 = vadd.f32 %v1342_v24, %v1330_v15  ;;  %v1343_v27 = vmul.f32 %v1341_v25, %v1333_v19 }
 0xf55   :  { %v1346_v28 = vmul.f32 0.7978846, %v1344_v26  ;;  %v1345_v29 = vadd.f32 %v1343_v27, %v1333_v19  ;;  %v3099_v19 = vld [vmem:[%s4469_s7 + $0x1] ss:$0 sm:$0xff]  ;;  %s4518_s7 = smov 48  }
 0xf57   :  { %3631 = vtanh.f32 %v1346_v28  ;;  %v1347_v30 = vmul.f32 0.7978846, %v1345_v29 }
 0xf59   :  { %3633 = vtanh.f32 %v1347_v30 }
 0xf61   :  { %v3632_v31 = vpop.eup %3631 }
 0xf62   :  { %v1350_v32 = vadd.f32 1.0, %v3632_v31 }
 0xf63   :  { %v3634_v33 = vpop.eup %3633 }
 0xf64   :  { %v1351_v39 = vadd.f32 1.0, %v3634_v33  ;;  %v1352_v40 = vmul.f32 %v1350_v32, %v1336_v34 }
 0xf66   :  { %v1353_v42 = vmul.f32 %v1351_v39, %v1337_v36 }
 0xf68   :  { %v1354_v43 = vpack.c.bf16 %v1353_v42, %v1352_v40 }
 0xf6a   :  { %3395 = vmatmul.mubr.msk.bf16.vlgmr.msra.gmra.mrb[36].mxu1 %vm1394_vm7, %v1354_v43 }
 0xf6b   :  { %3414 = vmatprep.mubr.msk.bf16.mxu1 %vm3712_vm1, %v3711_v21 }
0x103d   :  { %v1432_v46 = vpop.f32.mrb[36].mxu1 }
0x103e   :  { %v1433_v47 = vadd.f32 %v3086_v44, %v1432_v46  ;;  %v3396_v49 = vpop.f32.mrb[37].mxu1 }
0x103f   :  { %v1435_v50 = vpop.f32.mrb[38].mxu1 }
0x1040   :  { %v1436_v51 = vadd.f32 %v3086_v44, %v1435_v50  ;;  %v3397_v52 = vpop.f32.mrb[39].mxu1  ;;  %v1439_v53 = vadd.f32 %v1433_v47, %v1266_v7 }
0x1042   :  { %v1443_v54 = vsel %vm89_vm0, %v1439_v53, 0.0  ;;  %v1440_v55 = vadd.f32 %v1436_v51, %v1267_v8 }
0x1043   :  { %1444 = vadd.xlane.f32.xlu0 %v1443_v54 }
0x1044   :  { %v1446_v37 = vsel %vm89_vm0, %v1440_v55, 0.0 }
0x1045   :  { %1447 = vadd.xlane.f32.xlu1 %v1446_v37 }
0x10d0   :  { %v1445_v38 = vpop.xlane.xlu0 %1444 }
0x10d1   :  { %v1449_v56 = vmul.f32 0.03125, %v1445_v38 }
0x10d2   :  { %v1448_v57 = vpop.xlane.xlu1 %1447 }
0x10d3   :  { %v1451_v58 = vsub.f32 %v1439_v53, %v1449_v56  ;;  %v1450_v60 = vmul.f32 0.03125, %v1448_v57 }
0x10d5   :  { %v1452_v48 = vsub.f32 %v1440_v55, %v1450_v60  ;;  %v1453_v35 = vmul.f32 %v1451_v58, %v1451_v58 }
0x10d7   :  { %v1455_v41 = vsel %vm89_vm0, %v1453_v35, 0.0  ;;  %v1454_v61 = vmul.f32 %v1452_v48, %v1452_v48 }
0x10d8   :  { %1456 = vadd.xlane.f32.xlu0 %v1455_v41 }
0x10d9   :  { %v1458_v62 = vsel %vm89_vm0, %v1454_v61, 0.0 }
0x10da   :  { %1459 = vadd.xlane.f32.xlu1 %v1458_v62 }
0x1165   :  { %v1457_v3 = vpop.xlane.xlu0 %1456 }
0x1166   :  { %v1461_v4 = vmul.f32 0.03125, %v1457_v3 }
0x1167   :  { %v1460_v5 = vpop.xlane.xlu1 %1459 }
0x1168   :  { %v1463_v6 = vadd.f32 1e-12, %v1461_v4  ;;  %v1462_v7 = vmul.f32 0.03125, %v1460_v5 }
0x116a   :  { %3635 = vrsqrt.f32 %v1463_v6  ;;  %v1464_v8 = vadd.f32 1e-12, %v1462_v7 }
0x116c   :  { %3637 = vrsqrt.f32 %v1464_v8 }
0x1174   :  { %v3636_v9 = vpop.eup %3635 }
0x1175   :  { %v1467_v11 = vmul.f32 %v3636_v9, %v1451_v58 }
0x1176   :  { %v3638_v12 = vpop.eup %3637 }
0x1177   :  { %v1475_v45 = vmul.f32 %v3092_v10, %v1467_v11  ;;  %v1468_v13 = vmul.f32 %v3638_v12, %v1452_v48 }
0x1179   :  { %v1476_v15 = vmul.f32 %v3092_v10, %v1468_v13  ;;  %v4158_v16 = vadd.f32 %v3093_v14, %v1475_v45 }
0x117b   :  { %v4160_v17 = vadd.f32 %v3093_v14, %v1476_v15 }
0x117d   :  { %v1485_v18 = vpack.c.bf16 %v4160_v17, %v4158_v16 }
0x117f   :  { %3403 = vmatmul.mubr.msk.bf16.vlgmr.msra.gmra.mrb[40].mxu0 %vm89_vm0, %v1485_v18 }
0x1180   :  { %3408 = vmatprep.mubr.msk.bf16.mxu0 %vm3712_vm1, %v3711_v21 }
0x1252   :  { %v1548_v20 = vpop.f32.mrb[40].mxu0 }
0x1253   :  { %v1549_v22 = vadd.f32 %v3099_v19, %v1548_v20  ;;  %v3404_v23 = vpop.f32.mrb[41].mxu0 }
0x1254   :  { %v1551_v24 = vpop.f32.mrb[42].mxu0 }
0x1255   :  { %v4170_v25 = vpack.c.bf16 %v1549_v22, %v1549_v22  ;;  %v1552_v26 = vadd.f32 %v3099_v19, %v1551_v24  ;;  %v3405_v27 = vpop.f32.mrb[43].mxu0 }
0x1257   :  { %v4172_v28 = vpack.c.bf16 %v1552_v26, %v1552_v26  ;;  %1558 = vrot.lane.b32.xlu0 %v4170_v25, %s3713_s1 }
0x1259   :  { %1607 = vrot.lane.b32.xlu1 %v4172_v28, %s3713_s1  ;;  %s4519_s1 = smov 72  }
0x12c9   :  { %v1559_v29 = vpop.permute.xlu0 %1558 }
0x12ca   :  { %v1564_v30 = vsel %vm240_vm2, %v1559_v29, 0 }
0x12cb   :  { %3407 = vmatpush3.bf16.xpose.msra.mxu0 %v1564_v30  ;;  %v1608_v31 = vpop.permute.xlu1 %1607 }
0x12cc   :  { %v1613_v32 = vsel %vm240_vm2, %v1608_v31, 0  ;;  %3418 = vmatprep.subr.bf16.mxu0 %v3711_v21 }
0x12cd   :  { %3413 = vmatpush3.bf16.xpose.msra.mxu1 %v1613_v32 }
0x12ce   :  { %3424 = vmatprep.subr.bf16.mxu1 %v3711_v21 }
0x12d2   :  { %3409 = vmatmul.mubr.msk.bf16.vlgmr.msra.gmra.mrb[44].mxu0 %vm240_vm2, %v4170_v25 }
0x12d3   :  { %3420 = vmatprep.mubr.msk.bf16.mxu0 %vm3712_vm1, %v3711_v21 }
0x12d4   :  { %3415 = vmatmul.mubr.msk.bf16.vlgmr.msra.gmra.mrb[40].mxu1 %vm240_vm2, %v4172_v28 }
0x12d5   :  { %3426 = vmatprep.mubr.msk.bf16.mxu1 %vm3712_vm1, %v3711_v21 }
0x13a5   :  { %v1600_v33 = vpop.f32.mrb[44].mxu0 }
0x13a6   :  { %v1601_v34 = vadd.f32 %v1600_v33, %v3920_v0  ;;  %v3410_v36 = vpop.f32.mrb[45].mxu0 }
0x13a7   :  { %v1603_v39 = vpop.f32.mrb[46].mxu0  ;;  %v1649_v40 = vpop.f32.mrb[40].mxu1 }
0x13a8   :  { %v1650_v42 = vadd.f32 %v1649_v40, %v3922_v1  ;;  %v3411_v43 = vpop.f32.mrb[47].mxu0  ;;  %v3416_v44 = vpop.f32.mrb[41].mxu1  ;;  %v1655_v46 = vsel %vm240_vm2, %v1601_v34, -inf }
0x13a9   :  { %v1652_v47 = vpop.f32.mrb[42].mxu1  ;;  %1656 = vmax.xlane.f32.xlu1 %v1655_v46 }
0x13aa   :  { %v3417_v49 = vpop.f32.mrb[43].mxu1  ;;  %v1658_v50 = vsel %vm240_vm2, %v1650_v42, -inf }
0x13ab   :  { %1659 = vmax.xlane.f32.xlu0 %v1658_v50 }
0x13ba   :  { %1727 = vrot.lane.b32.xlu1 %v4172_v28, %s3715_s6 }
0x13be   :  { %1779 = vrot.lane.b32.xlu1 %v4170_v25, %s3716_s26 }
0x1436   :  { %v1657_v51 = vpop.xlane.xlu1 %1656 }
0x1437   :  { %v1661_v52 = vsub.f32 %v1601_v34, %v1657_v51 }
0x1438   :  { %v1660_v53 = vpop.xlane.xlu0 %1659 }
0x1439   :  { %v1663_v54 = vmul.f32 1.442695, %v1661_v52  ;;  %v1662_v55 = vsub.f32 %v1650_v42, %v1660_v53 }
0x143a   :  { %v1728_v37 = vpop.permute.xlu1 %1727 }
0x143b   :  { %3639 = vpow2.f32 %v1663_v54  ;;  %v1665_v38 = vmul.f32 1.442695, %v1662_v55  ;;  %v1733_v56 = vsel %vm365_vm3, %v1728_v37, 0 }
0x143c   :  { %3425 = vmatpush3.bf16.msra.mxu1 %v1733_v56 }
0x143d   :  { %3641 = vpow2.f32 %v1665_v38  ;;  %3436 = vmatprep.subr.bf16.mxu1 %v3711_v21 }
0x143e   :  { %v1780_v35 = vpop.permute.xlu1 %1779 }
0x143f   :  { %v1785_v8 = vsel %vm240_vm2, %v1780_v35, 0 }
0x1445   :  { %v3640_v57 = vpop.eup %3639 }
0x1446   :  { %v1667_v58 = vsel %vm240_vm2, %v3640_v57, 0.0 }
0x1447   :  { %v3642_v60 = vpop.eup %3641  ;;  %1668 = vadd.xlane.f32.xlu0 %v1667_v58 }
0x1448   :  { %v1670_v48 = vsel %vm240_vm2, %v3642_v60, 0.0 }
0x1449   :  { %1671 = vadd.xlane.f32.xlu1 %v1670_v48 }
0x145a   :  { %1829 = vrot.lane.b32.xlu1 %v4172_v28, %s3716_s26  ;;  %s4521_s26 = smov 40  }
0x145d   :  { %1679 = vrot.lane.b32.xlu0 %v4170_v25, %s3715_s6  ;;  %s4520_s6 = smov 104  }
0x145e   :  { %1827 = vrot.lane.b32.xlu1 %v4172_v28, %s3717_s2 }
0x1461   :  { %1777 = vrot.lane.b32.xlu0 %v4170_v25, %s3717_s2  ;;  %s4522_s2 = smov 8  }
0x14d4   :  { %v1669_v41 = vpop.xlane.xlu0 %1668 }
0x14d5   :  { %3643 = vrcp.f32 %v1669_v41 }
0x14d6   :  { %v1672_v61 = vpop.xlane.xlu1 %1671 }
0x14d7   :  { %3645 = vrcp.f32 %v1672_v61 }
0x14d8   :  { %v1680_v62 = vpop.permute.xlu0 %1679 }
0x14d9   :  { %v1685_v63 = vsel %vm365_vm3, %v1680_v62, 0 }
0x14da   :  { %3419 = vmatpush3.bf16.msra.mxu0 %v1685_v63  ;;  %v1830_v7 = vpop.permute.xlu1 %1829 }
0x14db   :  { %3430 = vmatprep.subr.bf16.mxu0 %v3711_v21  ;;  %v1835_v10 = vsel %vm240_vm2, %v1830_v7, 0 }
0x14dc   :  { %v1778_v11 = vpop.permute.xlu0 %1777 }
0x14de   :  { %v1828_v12 = vpop.permute.xlu1 %1827 }
0x14df   :  { %v3644_v2 = vpop.eup %3643 }
0x14e0   :  { %v1675_v3 = vmul.f32 %v3644_v2, %v3640_v57 }
0x14e1   :  { %v3646_v4 = vpop.eup %3645 }
0x14e2   :  { %v1676_v5 = vmul.f32 %v3646_v4, %v3642_v60  ;;  %v1677_v6 = vpack.c.bf16 %v1675_v3, %v1675_v3 }
0x14e4   :  { %3421 = vmatmul.mubr.msk.bf16.vlgmr.msra.gmra.mrb[48].mxu0 %vm240_vm2, %v1677_v6  ;;  %v1678_v9 = vpack.c.bf16 %v1676_v5, %v1676_v5 }
0x14e5   :  { %3431 = vmatpush3.bf16.xpose.msra.mxu0 %v1785_v8  ;;  %3432 = vmatprep.mubr.msk.bf16.mxu0 %vm3712_vm1, %v3711_v21 }
0x14e6   :  { %3427 = vmatmul.mubr.msk.bf16.vlgmr.msra.gmra.mrb[44].mxu1 %vm240_vm2, %v1678_v9  ;;  %3442 = vmatprep.subr.bf16.mxu0 %v3711_v21 }
0x14e7   :  { %3437 = vmatpush3.bf16.xpose.msra.mxu1 %v1835_v10  ;;  %3438 = vmatprep.mubr.msk.bf16.mxu1 %vm3712_vm1, %v3711_v21 }
0x14e8   :  { %3448 = vmatprep.subr.bf16.mxu1 %v3711_v21 }
0x14ec   :  { %3433 = vmatmul.mubr.msk.bf16.vlgmr.msra.gmra.mrb[52].mxu0 %vm240_vm2, %v1778_v11 }
0x14ed   :  { %3444 = vmatprep.mubr.msk.bf16.mxu0 %vm3712_vm1, %v3711_v21 }
0x14ee   :  { %3439 = vmatmul.mubr.msk.bf16.vlgmr.msra.gmra.mrb[48].mxu1 %vm240_vm2, %v1828_v12 }
0x14ef   :  { %3450 = vmatprep.mubr.msk.bf16.mxu1 %vm3712_vm1, %v3711_v21 }
0x15b7   :  { %v1721_v45 = vpop.f32.mrb[48].mxu0 }
0x15b8   :  { %1775 = vst.msk [vmem:[#allocation2] sm:$0xff] %vm240_vm2, %v1721_v45  ;;  %v3422_v13 = vpop.f32.mrb[49].mxu0 }
0x15b9   :  { %v1724_v14 = vpop.f32.mrb[50].mxu0  ;;  %v1769_v15 = vpop.f32.mrb[44].mxu1 }
0x15ba   :  { %1776 = vst.msk [vmem:[#allocation2 + $0x8] sm:$0xff] %vm240_vm2, %v1769_v15  ;;  %v3423_v18 = vpop.f32.mrb[51].mxu0  ;;  %v3428_v19 = vpop.f32.mrb[45].mxu1 }
0x15bb   :  { %v1772_v20 = vpop.f32.mrb[46].mxu1 }
0x15bc   :  { %v3429_v22 = vpop.f32.mrb[47].mxu1 }
0x15bf   :  { %v1821_v23 = vpop.f32.mrb[52].mxu0 }
0x15c0   :  { %v1822_v24 = vadd.f32 %v1821_v23, %v3920_v0  ;;  %v3434_v26 = vpop.f32.mrb[53].mxu0 }
0x15c1   :  { %v1824_v27 = vpop.f32.mrb[54].mxu0  ;;  %v1871_v29 = vpop.f32.mrb[48].mxu1 }
0x15c2   :  { %v1872_v30 = vadd.f32 %v1871_v29, %v3922_v1  ;;  %v3435_v31 = vpop.f32.mrb[55].mxu0  ;;  %v3440_v32 = vpop.f32.mrb[49].mxu1  ;;  %v1877_v33 = vsel %vm240_vm2, %v1822_v24, -inf }
0x15c3   :  { %v1874_v34 = vpop.f32.mrb[50].mxu1  ;;  %1878 = vmax.xlane.f32.xlu0 %v1877_v33 }
0x15c4   :  { %v3441_v36 = vpop.f32.mrb[51].mxu1  ;;  %v1880_v39 = vsel %vm240_vm2, %v1872_v30, -inf }
0x15c5   :  { %1881 = vmax.xlane.f32.xlu1 %v1880_v39 }
0x15d6   :  { %1949 = vrot.lane.b32.xlu1 %v4172_v28, %s3718_s27 }
0x15da   :  { %2009 = vrot.lane.b32.xlu1 %v4170_v25, %s3719_s3 }
0x15de   :  { %2059 = vrot.lane.b32.xlu1 %v4172_v28, %s3719_s3 }
0x15e2   :  { %2057 = vrot.lane.b32.xlu1 %v4172_v28, %s3720_s28 }
0x1650   :  { %v1879_v40 = vpop.xlane.xlu0 %1878 }
0x1651   :  { %v1883_v42 = vsub.f32 %v1822_v24, %v1879_v40 }
0x1652   :  { %v1882_v43 = vpop.xlane.xlu1 %1881 }
0x1653   :  { %v1885_v44 = vmul.f32 1.442695, %v1883_v42  ;;  %v1884_v46 = vsub.f32 %v1872_v30, %v1882_v43 }
0x1655   :  { %3647 = vpow2.f32 %v1885_v44  ;;  %v1887_v47 = vmul.f32 1.442695, %v1884_v46 }
0x1656   :  { %v1950_v49 = vpop.permute.xlu1 %1949 }
0x1657   :  { %3649 = vpow2.f32 %v1887_v47  ;;  %v1955_v50 = vsel %vm365_vm3, %v1950_v49, 0 }
0x1658   :  { %3449 = vmatpush3.bf16.msra.mxu1 %v1955_v50 }
0x1659   :  { %3460 = vmatprep.subr.bf16.mxu1 %v3711_v21 }
0x165a   :  { %v2010_v58 = vpop.permute.xlu1 %2009 }
0x165b   :  { %v2015_v62 = vsel %vm240_vm2, %v2010_v58, 0 }
0x165e   :  { %v2060_v61 = vpop.permute.xlu1 %2059 }
0x165f   :  { %v3648_v51 = vpop.eup %3647  ;;  %v2065_v2 = vsel %vm240_vm2, %v2060_v61, 0 }
0x1660   :  { %v1889_v52 = vsel %vm240_vm2, %v3648_v51, 0.0 }
0x1661   :  { %v3650_v53 = vpop.eup %3649  ;;  %1890 = vadd.xlane.f32.xlu0 %v1889_v52 }
0x1662   :  { %v1892_v54 = vsel %vm240_vm2, %v3650_v53, 0.0  ;;  %v2058_v4 = vpop.permute.xlu1 %2057 }
0x1665   :  { %1893 = vadd.xlane.f32.xlu0 %v1892_v54 }
0x167b   :  { %1901 = vrot.lane.b32.xlu0 %v4170_v25, %s3718_s27  ;;  %s4523_s27 = smov 16  }
0x167f   :  { %2007 = vrot.lane.b32.xlu0 %v4170_v25, %s3720_s28 }
0x16ee   :  { %v1891_v55 = vpop.xlane.xlu0 %1890 }
0x16ef   :  { %3651 = vrcp.f32 %v1891_v55 }
0x16f2   :  { %v1894_v37 = vpop.xlane.xlu0 %1893 }
0x16f3   :  { %3653 = vrcp.f32 %v1894_v37 }
0x16f6   :  { %v1902_v38 = vpop.permute.xlu0 %1901 }
0x16f7   :  { %v1907_v56 = vsel %vm365_vm3, %v1902_v38, 0 }
0x16f8   :  { %3443 = vmatpush3.bf16.msra.mxu0 %v1907_v56 }
0x16f9   :  { %v3652_v57 = vpop.eup %3651  ;;  %3454 = vmatprep.subr.bf16.mxu0 %v3711_v21 }
0x16fa   :  { %v1897_v60 = vmul.f32 %v3652_v57, %v3648_v51  ;;  %v2008_v3 = vpop.permute.xlu0 %2007 }
0x16fc   :  { %v1899_v48 = vpack.c.bf16 %v1897_v60, %v1897_v60 }
0x16fd   :  { %v3654_v35 = vpop.eup %3653 }
0x16fe   :  { %v1898_v41 = vmul.f32 %v3654_v35, %v3650_v53  ;;  %3445 = vmatmul.mubr.msk.bf16.vlgmr.msra.gmra.mrb[56].mxu0 %vm240_vm2, %v1899_v48 }
0x16ff   :  { %3456 = vmatprep.mubr.msk.bf16.mxu0 %vm3712_vm1, %v3711_v21 }
0x1700   :  { %v1900_v63 = vpack.c.bf16 %v1898_v41, %v1898_v41 }
0x1701   :  { %3455 = vmatpush3.bf16.xpose.msra.mxu0 %v2015_v62 }
0x1702   :  { %3451 = vmatmul.mubr.msk.bf16.vlgmr.msra.gmra.mrb[52].mxu1 %vm240_vm2, %v1900_v63  ;;  %3466 = vmatprep.subr.bf16.mxu0 %v3711_v21 }
0x1703   :  { %3461 = vmatpush3.bf16.xpose.msra.mxu1 %v2065_v2  ;;  %3462 = vmatprep.mubr.msk.bf16.mxu1 %vm3712_vm1, %v3711_v21 }
0x1704   :  { %3472 = vmatprep.subr.bf16.mxu1 %v3711_v21 }
0x1708   :  { %3457 = vmatmul.mubr.msk.bf16.vlgmr.msra.gmra.mrb[60].mxu0 %vm240_vm2, %v2008_v3 }
0x1709   :  { %3468 = vmatprep.mubr.msk.bf16.mxu0 %vm3712_vm1, %v3711_v21 }
0x170a   :  { %3463 = vmatmul.mubr.msk.bf16.vlgmr.msra.gmra.mrb[56].mxu1 %vm240_vm2, %v2058_v4 }
0x170b   :  { %3474 = vmatprep.mubr.msk.bf16.mxu1 %vm3712_vm1, %v3711_v21 }
0x17d1   :  { %v4268_v5 = vpop.f32.mrb[56].mxu0 }
0x17d2   :  { %v3446_v6 = vpop.f32.mrb[57].mxu0 }
0x17d3   :  { %v1946_v7 = vpop.f32.mrb[58].mxu0 }
0x17d4   :  { %v3447_v8 = vpop.f32.mrb[59].mxu0 }
0x17d5   :  { %v4270_v9 = vpop.f32.mrb[52].mxu1 }
0x17d6   :  { %v3452_v10 = vpop.f32.mrb[53].mxu1 }
0x17d7   :  { %v1994_v11 = vpop.f32.mrb[54].mxu1 }
0x17d8   :  { %v3453_v12 = vpop.f32.mrb[55].mxu1 }
0x17db   :  { %v2051_v45 = vpop.f32.mrb[60].mxu0 }
0x17dc   :  { %v2052_v13 = vadd.f32 %v2051_v45, %v3920_v0  ;;  %v3458_v14 = vpop.f32.mrb[61].mxu0 }
0x17dd   :  { %v2054_v15 = vpop.f32.mrb[62].mxu0  ;;  %v2101_v18 = vpop.f32.mrb[56].mxu1 }
0x17de   :  { %v2102_v19 = vadd.f32 %v2101_v18, %v3922_v1  ;;  %v3459_v20 = vpop.f32.mrb[63].mxu0  ;;  %v3464_v22 = vpop.f32.mrb[57].mxu1  ;;  %v2107_v23 = vsel %vm240_vm2, %v2052_v13, -inf }
0x17df   :  { %v2104_v24 = vpop.f32.mrb[58].mxu1  ;;  %2108 = vmax.xlane.f32.xlu0 %v2107_v23 }
0x17e0   :  { %v3465_v26 = vpop.f32.mrb[59].mxu1  ;;  %v2110_v27 = vsel %vm240_vm2, %v2102_v19, -inf }
0x17e1   :  { %2111 = vmax.xlane.f32.xlu1 %v2110_v27 }
0x17f2   :  { %2179 = vrot.lane.b32.xlu1 %v4172_v28, %s4518_s7 }
0x17f6   :  { %2239 = vrot.lane.b32.xlu1 %v4170_v25, %s4519_s1 }
0x17fa   :  { %2289 = vrot.lane.b32.xlu1 %v4172_v28, %s4519_s1 }
0x17fe   :  { %2287 = vrot.lane.b32.xlu1 %v4172_v28, %s4520_s6 }
0x186c   :  { %v2109_v29 = vpop.xlane.xlu0 %2108 }
0x186d   :  { %v2113_v30 = vsub.f32 %v2052_v13, %v2109_v29 }
0x186e   :  { %v2112_v31 = vpop.xlane.xlu1 %2111 }
0x186f   :  { %v2115_v32 = vmul.f32 1.442695, %v2113_v30  ;;  %v2114_v33 = vsub.f32 %v2102_v19, %v2112_v31 }
0x1871   :  { %3655 = vpow2.f32 %v2115_v32  ;;  %v2117_v34 = vmul.f32 1.442695, %v2114_v33 }
0x1872   :  { %v2180_v36 = vpop.permute.xlu1 %2179 }
0x1873   :  { %3657 = vpow2.f32 %v2117_v34  ;;  %v2185_v39 = vsel %vm365_vm3, %v2180_v36, 0 }
0x1874   :  { %3473 = vmatpush3.bf16.msra.mxu1 %v2185_v39 }
0x1875   :  { %3484 = vmatprep.subr.bf16.mxu1 %v3711_v21 }
0x1876   :  { %v2240_v52 = vpop.permute.xlu1 %2239 }
0x1877   :  { %v2245_v56 = vsel %vm240_vm2, %v2240_v52, 0 }
0x187a   :  { %v2290_v38 = vpop.permute.xlu1 %2289 }
0x187b   :  { %v3656_v40 = vpop.eup %3655  ;;  %v2295_v58 = vsel %vm240_vm2, %v2290_v38, 0 }
0x187c   :  { %v2119_v42 = vsel %vm240_vm2, %v3656_v40, 0.0 }
0x187d   :  { %v3658_v43 = vpop.eup %3657  ;;  %2120 = vadd.xlane.f32.xlu0 %v2119_v42 }
0x187e   :  { %v2122_v44 = vsel %vm240_vm2, %v3658_v43, 0.0  ;;  %v2288_v48 = vpop.permute.xlu1 %2287 }
0x1881   :  { %2123 = vadd.xlane.f32.xlu0 %v2122_v44 }
0x1897   :  { %2131 = vrot.lane.b32.xlu0 %v4170_v25, %s4518_s7 }
0x189b   :  { %2237 = vrot.lane.b32.xlu0 %v4170_v25, %s4520_s6  ;;  %s3728_s6 = smov [#allocation3]  }
0x190a   :  { %v2121_v46 = vpop.xlane.xlu0 %2120 }
0x190b   :  { %3659 = vrcp.f32 %v2121_v46 }
0x190e   :  { %v2124_v47 = vpop.xlane.xlu0 %2123 }
0x190f   :  { %3661 = vrcp.f32 %v2124_v47 }
0x1912   :  { %v2132_v49 = vpop.permute.xlu0 %2131 }
0x1913   :  { %v2137_v50 = vsel %vm365_vm3, %v2132_v49, 0  ;;  %v3577_v49 = vld [vmem:[%s4470_s8 + $0x10] sm:$0xff]  }
0x1914   :  { %3467 = vmatpush3.bf16.msra.mxu0 %v2137_v50  ;;  %v3578_v50 = vld [vmem:[%s4470_s8 + $0x18] sm:$0xff]  }
0x1915   :  { %v3660_v51 = vpop.eup %3659  ;;  %3478 = vmatprep.subr.bf16.mxu0 %v3711_v21 }
0x1916   :  { %v2127_v53 = vmul.f32 %v3660_v51, %v3656_v40  ;;  %v2238_v60 = vpop.permute.xlu0 %2237 }
0x1918   :  { %v2129_v54 = vpack.c.bf16 %v2127_v53, %v2127_v53 }
0x1919   :  { %v3662_v55 = vpop.eup %3661 }
0x191a   :  { %v2128_v37 = vmul.f32 %v3662_v55, %v3658_v43  ;;  %3469 = vmatmul.mubr.msk.bf16.vlgmr.msra.gmra.mrb[64].mxu0 %vm240_vm2, %v2129_v54 }
0x191b   :  { %3480 = vmatprep.mubr.msk.bf16.mxu0 %vm3712_vm1, %v3711_v21 }
0x191c   :  { %v2130_v57 = vpack.c.bf16 %v2128_v37, %v2128_v37 }
0x191d   :  { %3479 = vmatpush3.bf16.xpose.msra.mxu0 %v2245_v56 }
0x191e   :  { %3475 = vmatmul.mubr.msk.bf16.vlgmr.msra.gmra.mrb[60].mxu1 %vm240_vm2, %v2130_v57  ;;  %3490 = vmatprep.subr.bf16.mxu0 %v3711_v21 }
0x191f   :  { %3485 = vmatpush3.bf16.xpose.msra.mxu1 %v2295_v58  ;;  %3486 = vmatprep.mubr.msk.bf16.mxu1 %vm3712_vm1, %v3711_v21 }
0x1920   :  { %3496 = vmatprep.subr.bf16.mxu1 %v3711_v21 }
0x1924   :  { %3481 = vmatmul.mubr.msk.bf16.vlgmr.msra.gmra.mrb[68].mxu0 %vm240_vm2, %v2238_v60 }
0x1925   :  { %3492 = vmatprep.mubr.msk.bf16.mxu0 %vm3712_vm1, %v3711_v21 }
0x1926   :  { %3487 = vmatmul.mubr.msk.bf16.vlgmr.msra.gmra.mrb[64].mxu1 %vm240_vm2, %v2288_v48 }
0x1927   :  { %3498 = vmatprep.mubr.msk.bf16.mxu1 %vm3712_vm1, %v3711_v21 }
0x19ed   :  { %v2173_v35 = vpop.f32.mrb[64].mxu0 }
0x19ee   :  { %v3470_v41 = vpop.f32.mrb[65].mxu0 }
0x19ef   :  { %v2176_v61 = vpop.f32.mrb[66].mxu0  ;;  %v3124_v41 = vld [vmem:[%s4471_s9 + $0x1] ss:$0 sm:$0xff] }
0x19f0   :  { %v3471_v62 = vpop.f32.mrb[67].mxu0 }
0x19f1   :  { %v2221_v63 = vpop.f32.mrb[60].mxu1 }
0x19f2   :  { %v3476_v2 = vpop.f32.mrb[61].mxu1 }
0x19f3   :  { %v2224_v3 = vpop.f32.mrb[62].mxu1 }
0x19f4   :  { %v3477_v4 = vpop.f32.mrb[63].mxu1 }
0x19f7   :  { %v2281_v6 = vpop.f32.mrb[68].mxu0 }
0x19f8   :  { %v2282_v7 = vadd.f32 %v2281_v6, %v3920_v0  ;;  %v3482_v8 = vpop.f32.mrb[69].mxu0 }
0x19f9   :  { %v2284_v10 = vpop.f32.mrb[70].mxu0  ;;  %v2331_v11 = vpop.f32.mrb[64].mxu1 }
0x19fa   :  { %v2332_v12 = vadd.f32 %v2331_v11, %v3922_v1  ;;  %v3483_v45 = vpop.f32.mrb[71].mxu0  ;;  %v3488_v13 = vpop.f32.mrb[65].mxu1  ;;  %v2337_v14 = vsel %vm240_vm2, %v2282_v7, -inf }
0x19fb   :  { %v2334_v15 = vpop.f32.mrb[66].mxu1  ;;  %2338 = vmax.xlane.f32.xlu0 %v2337_v14 }
0x19fc   :  { %v3489_v18 = vpop.f32.mrb[67].mxu1  ;;  %v2340_v19 = vsel %vm240_vm2, %v2332_v12, -inf }
0x19fd   :  { %2341 = vmax.xlane.f32.xlu1 %v2340_v19 }
0x1a0e   :  { %2409 = vrot.lane.b32.xlu1 %v4172_v28, %s4521_s26 }
0x1a12   :  { %1999 = vrot.lane.b32.xlu1 %v4268_v5, %s4522_s2 }
0x1a16   :  { %2001 = vrot.lane.b32.xlu1 %v4270_v9, %s4522_s2 }
0x1a1a   :  { %2231 = vrot.lane.b32.xlu1 %v2221_v63, %s4523_s27 }
0x1a88   :  { %v2339_v0 = vpop.xlane.xlu0 %2338 }
0x1a89   :  { %v2343_v1 = vsub.f32 %v2282_v7, %v2339_v0 }
0x1a8a   :  { %v2342_v20 = vpop.xlane.xlu1 %2341 }
0x1a8b   :  { %v2345_v22 = vmul.f32 1.442695, %v2343_v1  ;;  %v2344_v23 = vsub.f32 %v2332_v12, %v2342_v20  ;;  %v3580_v1 = vld [vmem:[%s4474_s12 + $0x18] sm:$0xff]  }
0x1a8d   :  { %3663 = vpow2.f32 %v2345_v22  ;;  %v2347_v24 = vmul.f32 1.442695, %v2344_v23 }
0x1a8e   :  { %v2410_v26 = vpop.permute.xlu1 %2409 }
0x1a8f   :  { %3665 = vpow2.f32 %v2347_v24  ;;  %v2415_v27 = vsel %vm365_vm3, %v2410_v26, 0 }
0x1a90   :  { %3497 = vmatpush3.bf16.msra.mxu1 %v2415_v27 }
0x1a91   :  { %3510 = vmatprep.subr.bf16.mxu1 %v3711_v21 }
0x1a92   :  { %v2000_v28 = vpop.permute.xlu1 %1999 }
0x1a93   :  { %2005 = vst.msk [vmem:[#allocation2] sm:$0xff] %vm687_vm4, %v2000_v28 }
0x1a96   :  { %v2002_v5 = vpop.permute.xlu1 %2001 }
0x1a97   :  { %v3664_v9 = vpop.eup %3663  ;;  %2006 = vst.msk [vmem:[#allocation2 + $0x8] sm:$0xff] %vm687_vm4, %v2002_v5 }
0x1a98   :  { %v2349_v29 = vsel %vm240_vm2, %v3664_v9, 0.0 }
0x1a99   :  { %v3666_v30 = vpop.eup %3665  ;;  %2350 = vadd.xlane.f32.xlu0 %v2349_v29 }
0x1a9a   :  { %v2232_v31 = vpop.permute.xlu1 %2231  ;;  %v2352_v32 = vsel %vm240_vm2, %v3666_v30, 0.0 }
0x1a9b   :  { %2236 = vst.msk [vmem:[#allocation2 + $0x8] sm:$0xff] %vm918_vm5, %v2232_v31 }
0x1a9d   :  { %2353 = vadd.xlane.f32.xlu0 %v2352_v32  ;;  %v3131_v32 = vld [vmem:[%s4473_s11 + $0x1] ss:$0 sm:$0xff] }
0x1ab3   :  { %2361 = vrot.lane.b32.xlu0 %v4170_v25, %s4521_s26  ;;  %s3041_s26 = sshll.u32 %s3728_s6, 4  ;;  %s3042_s26 = int_to_ptr.vmem [resolvable:$true] %s3041_s26 }
0x1ab4   :  { %p3692_p1 = scmp.lt.s32.totalorder %s3042_s26, %s3042_s26 }
0x1ab7   :  { %2229 = vrot.lane.b32.xlu0 %v2173_v35, %s4523_s27 }
0x1b26   :  { %v2351_v33 = vpop.xlane.xlu0 %2350 }
0x1b27   :  { %3667 = vrcp.f32 %v2351_v33 }
0x1b2a   :  { %v2354_v34 = vpop.xlane.xlu0 %2353 }
0x1b2b   :  { %3669 = vrcp.f32 %v2354_v34 }
0x1b2e   :  { %v2362_v36 = vpop.permute.xlu0 %2361 }
0x1b2f   :  { %v2367_v39 = vsel %vm365_vm3, %v2362_v36, 0 }
0x1b30   :  { %3491 = vmatpush3.bf16.msra.mxu0 %v2367_v39 }
0x1b31   :  { %v3668_v40 = vpop.eup %3667  ;;  %3502 = vmatprep.subr.bf16.mxu0 %v3711_v21 }
0x1b32   :  { %v2357_v42 = vmul.f32 %v3668_v40, %v3664_v9  ;;  %v2230_v43 = vpop.permute.xlu0 %2229  ;;  %v3130_v9 = vld [vmem:[%s4472_s10 + $0x1] ss:$0 sm:$0xff]  ;;  %s3687_s10 = scalar_lea.vmem %s3042_s26, 32 }
0x1b33   :  { %2235 = vst.msk [vmem:[#allocation2] sm:$0xff] %vm918_vm5, %v2230_v43  ;;  %v3581_v40 = vld [vmem:[%s4476_s14 + $0x20] sm:$0xff]   ;;  %v3583_v43 = vld [vmem:[%s4476_s14 + $0x30] sm:$0xff]   ;;  %p3688_p0 = scmp.ne.s32.totalorder %s3042_s26, %s3687_s10  ;;  %p3693_p2 = scmp.lt.s32.totalorder %s3687_s10, %s3687_s10 }
0x1b34   :  { %v2359_v44 = vpack.c.bf16 %v2357_v42, %v2357_v42  ;;  %v3582_v42 = vld [vmem:[%s4476_s14 + $0x28] sm:$0xff]  }
0x1b35   :  { %v3670_v46 = vpop.eup %3669  ;;  %p3694_p3 = por %p3693_p2, %p3692_p1 }
0x1b36   :  { %v2358_v25 = vmul.f32 %v3670_v46, %v3666_v30  ;;  %3493 = vmatmul.mubr.msk.bf16.vlgmr.msra.gmra.mrb[72].mxu0 %vm240_vm2, %v2359_v44  ;;  %v3584_v44 = vld [vmem:[%s4476_s14 + $0x38] sm:$0xff]   ;;  %v3137_v46 = vld [vmem:[%s4475_s13 + $0x1] ss:$0 sm:$0xff] }
0x1b37   :  { %3506 = vmatprep.mubr.msk.bf16.mxu0 %vm3712_vm1, %v3711_v21  ;;  %3503 = vmatpush3.bf16.msra.mxu0 %v3577_v49  ;;  %p3695_p4 = pnand %p3694_p3, %p3688_p0 }
0x1b38   :  { %v2360_v47 = vpack.c.bf16 %v2358_v25, %v2358_v25  ;;  %3504 = vmatprep.subr.bf16.mxu0 %v3711_v21 }
0x1b3a   :  { %3499 = vmatmul.mubr.msk.bf16.vlgmr.msra.gmra.mrb[68].mxu1 %vm240_vm2, %v2360_v47 }
0x1b3b   :  { %3514 = vmatprep.mubr.msk.bf16.mxu1 %vm3712_vm1, %v3711_v21  ;;  %3505 = vmatpush3.bf16.msra.mxu0 %v3578_v50 }
0x1b3c   :  { %3518 = vmatprep.subr.bf16.mxu0 %v3711_v21 }
0x1c09   :  { %v2403_v51 = vpop.f32.mrb[72].mxu0 }
0x1c0a   :  { %2459 = vrot.lane.b32.xlu0 %v2403_v51, %s4524_s4  ;;  %v3494_v52 = vpop.f32.mrb[73].mxu0 }
0x1c0b   :  { %v2406_v53 = vpop.f32.mrb[74].mxu0 }
0x1c0c   :  { %v3495_v54 = vpop.f32.mrb[75].mxu0 }
0x1c0d   :  { %v2451_v55 = vpop.f32.mrb[68].mxu1 }
0x1c0e   :  { %2461 = vrot.lane.b32.xlu1 %v2451_v55, %s4524_s4  ;;  %v3500_v37 = vpop.f32.mrb[69].mxu1 }
0x1c0f   :  { %v2454_v38 = vpop.f32.mrb[70].mxu1 }
0x1c10   :  { %v3501_v56 = vpop.f32.mrb[71].mxu1 }
0x1c7c   :  { %v2460_v57 = vpop.permute.xlu0 %2459 }
0x1c7d   :  { %2465 = vst.msk [vmem:[#allocation2] sm:$0xff] %vm1149_vm6, %v2460_v57 }
0x1c80   :  { %v2462_v58 = vpop.permute.xlu1 %2461 }
0x1c81   :  { %2466 = vst.msk [vmem:[#allocation2 + $0x8] sm:$0xff] %vm1149_vm6, %v2462_v58 }
0x1c84   :  { %v2467_v60 = vld [vmem:[#allocation2] sm:$0xff] }
0x1c88   :  { %v2468_v48 = vld [vmem:[#allocation2 + $0x8] sm:$0xff] }
0x1c89   :  { %v2469_v35 = vpack.c.bf16 %v2468_v48, %v2467_v60 }
0x1c8b   :  { %3507 = vmatmul.mubr.msk.bf16.vlgmr.msra.gmra.mrb[76].mxu0 %vm89_vm0, %v2469_v35 }
0x1c8c   :  { %3526 = vmatprep.mubr.msk.bf16.mxu0 %vm3712_vm1, %v3711_v21  ;;  %3519 = vmatpush3.bf16.msra.mxu0 %v3581_v40 }
0x1c8d   :  { %3520 = vmatprep.subr.bf16.mxu0 %v3711_v21 }
0x1c90   :  { %3521 = vmatpush3.bf16.msra.mxu0 %v3582_v42  ;;  %v3159_v42 = vld [vmem:[%s4517_s30 + $0x1] ss:$0 sm:$0xff] }
0x1c91   :  { %3522 = vmatprep.subr.bf16.mxu0 %v3711_v21 }
0x1c94   :  { %3523 = vmatpush3.bf16.msra.mxu0 %v3583_v43 }
0x1c95   :  { %3524 = vmatprep.subr.bf16.mxu0 %v3711_v21 }
0x1c98   :  { %3525 = vmatpush3.bf16.msra.mxu0 %v3584_v44 }
0x1d5e   :  { %v2532_v61 = vpop.f32.mrb[76].mxu0 }
0x1d5f   :  { %v2533_v62 = vadd.f32 %v3124_v41, %v2532_v61  ;;  %v3508_v63 = vpop.f32.mrb[77].mxu0 }
0x1d60   :  { %v2535_v2 = vpop.f32.mrb[78].mxu0 }
0x1d61   :  { %v2539_v3 = vadd.f32 %v2533_v62, %v4158_v16  ;;  %v2536_v4 = vadd.f32 %v3124_v41, %v2535_v2  ;;  %v3509_v6 = vpop.f32.mrb[79].mxu0 }
0x1d63   :  { %v2540_v7 = vadd.f32 %v2536_v4, %v4160_v17  ;;  %v2545_v8 = vsel %vm89_vm0, %v2539_v3, 0.0  ;;  %v3579_v17 = vld [vmem:[%s4474_s12 + $0x10] sm:$0xff]  }
0x1d64   :  { %2546 = vadd.xlane.f32.xlu0 %v2545_v8  ;;  %3511 = vmatpush3.bf16.msra.mxu1 %v3579_v17 }
0x1d65   :  { %v2548_v10 = vsel %vm89_vm0, %v2540_v7, 0.0  ;;  %3512 = vmatprep.subr.bf16.mxu1 %v3711_v21 }
0x1d66   :  { %2549 = vadd.xlane.f32.xlu1 %v2548_v10 }
0x1d68   :  { %3513 = vmatpush3.bf16.msra.mxu1 %v3580_v1 }
0x1d69   :  { %3530 = vmatprep.subr.bf16.mxu1 %v3711_v21 }
0x1df1   :  { %v2547_v11 = vpop.xlane.xlu0 %2546 }
0x1df2   :  { %v2551_v12 = vmul.f32 0.03125, %v2547_v11 }
0x1df3   :  { %v2550_v45 = vpop.xlane.xlu1 %2549 }
0x1df4   :  { %v2553_v13 = vsub.f32 %v2539_v3, %v2551_v12  ;;  %v2552_v14 = vmul.f32 0.03125, %v2550_v45 }
0x1df6   :  { %v2554_v15 = vsub.f32 %v2540_v7, %v2552_v14  ;;  %v2555_v18 = vmul.f32 %v2553_v13, %v2553_v13  ;;  %v3150_v7 = vld [vmem:[%s4477_s15 + $0x1] ss:$0 sm:$0xff] }
0x1df8   :  { %v2557_v19 = vsel %vm89_vm0, %v2555_v18, 0.0  ;;  %v2556_v16 = vmul.f32 %v2554_v15, %v2554_v15 }
0x1df9   :  { %2558 = vadd.xlane.f32.xlu0 %v2557_v19 }
0x1dfa   :  { %v2560_v0 = vsel %vm89_vm0, %v2556_v16, 0.0 }
0x1dfd   :  { %2561 = vadd.xlane.f32.xlu0 %v2560_v0 }
0x1e86   :  { %v2559_v20 = vpop.xlane.xlu0 %2558 }
0x1e87   :  { %v2563_v22 = vmul.f32 0.03125, %v2559_v20 }
0x1e89   :  { %v2565_v23 = vadd.f32 1e-12, %v2563_v22 }
0x1e8a   :  { %v2562_v24 = vpop.xlane.xlu0 %2561 }
0x1e8b   :  { %3671 = vrsqrt.f32 %v2565_v23  ;;  %v2564_v26 = vmul.f32 0.03125, %v2562_v24 }
0x1e8d   :  { %v2566_v27 = vadd.f32 1e-12, %v2564_v26 }
0x1e8f   :  { %3673 = vrsqrt.f32 %v2566_v27 }
0x1e95   :  { %v3672_v28 = vpop.eup %3671 }
0x1e96   :  { %v2569_v5 = vmul.f32 %v3672_v28, %v2553_v13  ;;  %v3585_v28 = vld [vmem:[%s4480_s18] sm:$0xff]  }
0x1e98   :  { %v2577_v30 = vmul.f32 %v3130_v9, %v2569_v5  ;;  %v3586_v5 = vld [vmem:[%s4480_s18 + $0x8] sm:$0xff]  }
0x1e99   :  { %v3674_v29 = vpop.eup %3673 }
0x1e9a   :  { %v2570_v31 = vmul.f32 %v3674_v29, %v2554_v15  ;;  %v2585_v34 = vadd.f32 %v3131_v32, %v2577_v30 }
0x1e9c   :  { %v2578_v33 = vmul.f32 %v3130_v9, %v2570_v31 }
0x1e9e   :  { %v2586_v36 = vadd.f32 %v3131_v32, %v2578_v33 }
0x1ea0   :  { %v2587_v39 = vpack.c.bf16 %v2586_v36, %v2585_v34 }
0x1ea2   :  { %3515 = vmatmul.mubr.msk.bf16.vlgmr.msra.gmra.mrb[72].mxu1 %vm89_vm0, %v2587_v39 }
0x1ea3   :  { %3534 = vmatprep.mubr.msk.bf16.mxu1 %vm3712_vm1, %v3711_v21  ;;  %3531 = vmatpush3.bf16.msra.mxu1 %v3585_v28 }
0x1ea4   :  { %3532 = vmatprep.subr.bf16.mxu1 %v3711_v21 }
0x1ea7   :  { %3533 = vmatpush3.bf16.msra.mxu1 %v3586_v5 }
0x1ea8   :  { %3538 = vmatprep.subr.bf16.mxu1 %v3711_v21 }
0x1f75   :  { %v2650_v25 = vpop.f32.mrb[72].mxu1 }
0x1f76   :  { %v2651_v47 = vadd.f32 %v3137_v46, %v2650_v25  ;;  %v3516_v49 = vpop.f32.mrb[73].mxu1 }
0x1f77   :  { %v2653_v50 = vpop.f32.mrb[74].mxu1 }
0x1f78   :  { %v2659_v51 = vmul.f32 0.044715, %v2651_v47  ;;  %v2654_v52 = vadd.f32 %v3137_v46, %v2653_v50  ;;  %v3517_v53 = vpop.f32.mrb[75].mxu1  ;;  %v2657_v62 = vmul.f32 0.5, %v2651_v47 }
0x1f7a   :  { %v2661_v54 = vmul.f32 %v2659_v51, %v2651_v47  ;;  %v2660_v55 = vmul.f32 0.044715, %v2654_v52  ;;  %v2658_v63 = vmul.f32 0.5, %v2654_v52 }
0x1f7c   :  { %v2663_v37 = vmul.f32 %v2661_v54, %v2651_v47  ;;  %v2662_v38 = vmul.f32 %v2660_v55, %v2654_v52 }
0x1f7e   :  { %v2665_v56 = vadd.f32 %v2663_v37, %v2651_v47  ;;  %v2664_v57 = vmul.f32 %v2662_v38, %v2654_v52  ;;  %v3588_v37 = vld [vmem:[%s4482_s20] sm:$0xff]   ;;  %v3589_v38 = vld [vmem:[%s4482_s20 + $0x8] sm:$0xff]  }
0x1f80   :  { %v2667_v58 = vmul.f32 0.7978846, %v2665_v56  ;;  %v2666_v60 = vadd.f32 %v2664_v57, %v2654_v52  ;;  %v3587_v56 = vld [vmem:[%s4481_s19] ss:$0 sps:$4 sm:$0x11]  }
0x1f81   :  { %v2844_v57 = vrot.slane %v3587_v56, %v3916_v59 }
0x1f82   :  { %3675 = vtanh.f32 %v2667_v58  ;;  %v2668_v48 = vmul.f32 0.7978846, %v2666_v60 }
0x1f83   :  { %v2851_v58 = vrot.slane %v2844_v57, %v3916_v59 }
0x1f84   :  { %3677 = vtanh.f32 %v2668_v48 }
0x1f8c   :  { %v3676_v35 = vpop.eup %3675 }
0x1f8d   :  { %v2671_v41 = vadd.f32 1.0, %v3676_v35 }
0x1f8e   :  { %v3678_v61 = vpop.eup %3677 }
0x1f8f   :  { %v2672_v2 = vadd.f32 1.0, %v3678_v61  ;;  %v2673_v3 = vmul.f32 %v2671_v41, %v2657_v62 }
0x1f91   :  { %v2674_v4 = vmul.f32 %v2672_v2, %v2658_v63 }
0x1f93   :  { %v2675_v6 = vpack.c.bf16 %v2674_v4, %v2673_v3 }
0x1f95   :  { %3527 = vmatmul.mubr.msk.bf16.vlgmr.msra.gmra.mrb[80].mxu0 %vm1394_vm7, %v2675_v6 }
0x2068   :  { %v2754_v8 = vpop.f32.mrb[80].mxu0 }
0x2069   :  { %v2755_v10 = vadd.f32 %v3150_v7, %v2754_v8  ;;  %v3528_v11 = vpop.f32.mrb[81].mxu0 }
0x206a   :  { %v2757_v12 = vpop.f32.mrb[82].mxu0 }
0x206b   :  { %v2761_v45 = vadd.f32 %v2755_v10, %v2585_v34  ;;  %v2758_v13 = vadd.f32 %v3150_v7, %v2757_v12  ;;  %v3529_v14 = vpop.f32.mrb[83].mxu0 }
0x206d   :  { %v2762_v15 = vadd.f32 %v2758_v13, %v2586_v36  ;;  %v2767_v18 = vsel %vm89_vm0, %v2761_v45, 0.0  ;;  %v3158_v36 = vld [vmem:[%s4478_s16 + $0x1] ss:$0 sm:$0xff]  ;;  %v3590_v13 = vld [vmem:[%s4483_s21] ss:$0 sps:$4 sm:$0x11]  }
0x206e   :  { %2768 = vadd.xlane.f32.xlu1 %v2767_v18  ;;  %v2957_v14 = vrot.slane %v3590_v13, %v3916_v59 }
0x206f   :  { %v2770_v19 = vsel %vm89_vm0, %v2762_v15, 0.0 }
0x2070   :  { %2771 = vadd.xlane.f32.xlu0 %v2770_v19 }
0x20fb   :  { %v2769_v16 = vpop.xlane.xlu1 %2768 }
0x20fc   :  { %v2773_v0 = vmul.f32 0.03125, %v2769_v16 }
0x20fd   :  { %v2772_v17 = vpop.xlane.xlu0 %2771 }
0x20fe   :  { %v2775_v1 = vsub.f32 %v2761_v45, %v2773_v0  ;;  %v2774_v20 = vmul.f32 0.03125, %v2772_v17 }
0x2100   :  { %v2776_v22 = vsub.f32 %v2762_v15, %v2774_v20  ;;  %v2777_v23 = vmul.f32 %v2775_v1, %v2775_v1  ;;  %v2964_v15 = vrot.slane %v2957_v14, %v3916_v59 }
0x2102   :  { %v2779_v24 = vsel %vm89_vm0, %v2777_v23, 0.0  ;;  %v2778_v26 = vmul.f32 %v2776_v22, %v2776_v22 }
0x2103   :  { %2780 = vadd.xlane.f32.xlu1 %v2779_v24 }
0x2104   :  { %v2782_v27 = vsel %vm89_vm0, %v2778_v26, 0.0 }
0x2105   :  { %2783 = vadd.xlane.f32.xlu0 %v2782_v27 }
0x2190   :  { %v2781_v9 = vpop.xlane.xlu1 %2780 }
0x2191   :  { %v2785_v29 = vmul.f32 0.03125, %v2781_v9 }
0x2192   :  { %v2784_v30 = vpop.xlane.xlu0 %2783 }
0x2193   :  { %v2787_v31 = vadd.f32 1e-12, %v2785_v29  ;;  %v2786_v32 = vmul.f32 0.03125, %v2784_v30 }
0x2195   :  { %3679 = vrsqrt.f32 %v2787_v31  ;;  %v2788_v33 = vadd.f32 1e-12, %v2786_v32 }
0x2197   :  { %3681 = vrsqrt.f32 %v2788_v33 }
0x219f   :  { %v3680_v34 = vpop.eup %3679 }
0x21a0   :  { %v2791_v39 = vmul.f32 %v3680_v34, %v2775_v1 }
0x21a1   :  { %v3682_v40 = vpop.eup %3681 }
0x21a2   :  { %v2799_v43 = vmul.f32 %v3158_v36, %v2791_v39  ;;  %v2792_v44 = vmul.f32 %v3682_v40, %v2776_v22 }
0x21a4   :  { %v2807_v46 = vadd.f32 %v3159_v42, %v2799_v43  ;;  %v2800_v25 = vmul.f32 %v3158_v36, %v2792_v44 }
0x21a6   :  { %v2808_v47 = vadd.f32 %v3159_v42, %v2800_v25  ;;  %v2809_v49 = vpack.c.bf16 %v2807_v46, %v2807_v46 }
0x21a8   :  { %v2810_v50 = vpack.c.bf16 %v2808_v47, %v2808_v47  ;;  %v2818_v52 = vunpack.c.l.b16 %v2809_v49 }
0x21aa   :  { %v2819_v51 = vunpack.c.l.b16 %v2810_v50 }
0x21ac   :  { %v2820_v53 = vrot.slane %v2819_v51, 7 }
0x21ae   :  { %v2822_v54 = vsel %vm2821_vm8, %v2820_v53, %v2818_v52 }
0x21af   :  { %v2823_v55 = vpack.c.b16 %v2822_v54, %v2822_v54 }
0x21b1   :  { %3535 = vmatmul.mubr.msk.bf16.vlgmr.msra.gmra.mrb[76].mxu1 %vm89_vm0, %v2823_v55 }
0x21b2   :  { %3542 = vmatprep.mubr.msk.bf16.mxu1 %vm3712_vm1, %v3711_v21  ;;  %3539 = vmatpush3.bf16.msra.mxu1 %v3588_v37 }
0x21b3   :  { %3540 = vmatprep.subr.bf16.mxu1 %v3711_v21 }
0x21b6   :  { %3541 = vmatpush3.bf16.msra.mxu1 %v3589_v38 }
0x2284   :  { %v2890_v60 = vpop.f32.mrb[76].mxu1 }
0x2285   :  { %v2891_v48 = vadd.f32 %v2890_v60, %v2851_v58  ;;  %v3536_v35 = vpop.f32.mrb[77].mxu1 }
0x2286   :  { %v2893_v41 = vpop.f32.mrb[78].mxu1 }
0x2287   :  { %v2903_v61 = vrot.slane %v2891_v48, %v3916_v59  ;;  %v3537_v21 = vpop.f32.mrb[79].mxu1 }
0x2289   :  { %v2904_v62 = vcombine.high %v2903_v61, %v2903_v61  ;;  %v2911_v63 = vrot.slane %v2903_v61, %v3916_v59 }
0x228b   :  { %v2918_v2 = vrot.slane %v2904_v62, %v3916_v59  ;;  %3683 = vtanh.f32 %v2911_v63 }
0x228d   :  { %3685 = vtanh.f32 %v2918_v2 }
0x2295   :  { %v3684_v3 = vpop.eup %3683 }
0x2296   :  { %v2923_v6 = vpack.c.bf16 %v3684_v3, %v3684_v3 }
0x2297   :  { %v3686_v4 = vpop.eup %3685 }
0x2298   :  { %v2924_v7 = vpack.c.bf16 %v3686_v4, %v3686_v4  ;;  %v2932_v10 = vunpack.c.l.b16 %v2923_v6 }
0x229a   :  { %v2933_v8 = vunpack.c.l.b16 %v2924_v7 }
0x229c   :  { %v2934_v11 = vrot.slane %v2933_v8, 7 }
0x229e   :  { %v2935_v12 = vsel %vm2821_vm8, %v2934_v11, %v2932_v10 }
0x229f   :  { %v2936_v45 = vpack.c.b16 %v2935_v12, %v2935_v12 }
0x22a1   :  { %3543 = vmatmul.mubr.msk.bf16.vlgmr.msra.gmra.mrb[80].mxu1 %vm89_vm0, %v2936_v45 }
0x2374   :  { %v3003_v18 = vpop.f32.mrb[80].mxu1 }
0x2375   :  { %v3004_v19 = vadd.f32 %v3003_v18, %v2964_v15  ;;  %v3544_v16 = vpop.f32.mrb[81].mxu1 }
0x2376   :  { %v3006_v0 = vpop.f32.mrb[82].mxu1 }
0x2377   :  { %v3016_v17 = vrot.slane %v3004_v19, %v3916_v59  ;;  %v3545_v1 = vpop.f32.mrb[83].mxu1 }
0x2379   :  { %v3017_v20 = vcombine.high %v3016_v17, %v3016_v17  ;;  %3166 = vst.sshfl [vmem:[#allocation3] sm:$0x1 pattern:$0x73625140] %v3016_v17 }
0x237b   :  { %3167 = vst.sshfl [vmem:[#allocation3 + $0x1] sm:$0x1 pattern:$0x73625140] %v3017_v20 }
0x237c   :  { %3698 = shalt.err (!%p3695_p4)
}
0x237d   :  { %s3699_s11 = scalar_lea.hbm %s4484_s22, 32 }
0x237e   :  { %p3700_p5 = scmp.ne.s32.totalorder %s4484_s22, %s3699_s11  ;;  %p3703_p6 = scmp.lt.u32.totalorder %s3699_s11, %s4484_s22 }
0x2380   :  { %p3705_p7 = pnand %p3703_p6, %p3700_p5 }
0x2382   :  { %3708 = shalt.err (!%p3705_p7)
}
0x2383   :  { %s3729_s4 = smov 1  }
0x2384   :  { %3047 = dma.vmem_to_hbm [thread:$0]  %s3042_s26, 32, %s4484_s22, [#allocation4], %s4523_s27, %s4523_s27, %s3729_s4  }
0x2385   :  { %3709 = dma.done.wait [#allocation4], 32  }
0x2386   :  { %3710 = vsyncadd [#allocation4], 4294967264 }
0x2387   :  { %3051 = vsyncpa [#allocation4], 1 }

</bundles_post_ra>
